<compile_context>
chip_gen: v6e
topology: v6e:2x2x1
jax: 0.10.0
libtpu: 0.0.40
codegen_flags: <defaults>
</compile_context>

<pallas_src>
import functools
import math

import jax
import jax.numpy as jnp
from jax.experimental import pallas as pl
from jax.experimental.pallas import tpu as pltpu


ACT_DTYPE = jnp.bfloat16   # storage/MXU dtype for activations & weights
LN_EPS = 1e-5


# --------------------------------------------------------------------------- #
# tiling helpers / BlockSpec shorthands
# --------------------------------------------------------------------------- #

def _row_tile(rows, row_bytes, target=512, budget=4 << 20):
    """Largest 8-aligned divisor of `rows` within ~budget bytes per x-tile (else full)."""
    cap = max(8, min(target, budget // max(1, row_bytes)))
    for t in range(min(rows, cap), 0, -1):
        if rows % t == 0 and t % 8 == 0:
            return t
    return rows            # full-dim block always satisfies the (8, 128) rule


def _rows_spec(tile, feat):
    return pl.BlockSpec((tile, feat), lambda i: (i, 0))


def _const_spec(shape):
    return pl.BlockSpec(shape, lambda i: (0,) * len(shape))


# --------------------------------------------------------------------------- #
# shared math (used inside kernels and by the pure-JAX reference)
# --------------------------------------------------------------------------- #

def _gelu(x):
    # TODO(synk): nn.GELU() defaults to the exact erf form; tanh approximation used
    # for the portable EUP lowering (max abs deviation ~1e-3).
    c = math.sqrt(2.0 / math.pi)
    return 0.5 * x * (1.0 + jnp.tanh(c * (x + 0.044715 * x * x * x)))


def _layernorm(y, gamma, beta, eps, act):
    mean = jnp.mean(y, axis=-1, keepdims=True)
    cent = y - mean
    var = jnp.mean(cent * cent, axis=-1, keepdims=True)
    out = cent * jax.lax.rsqrt(var + eps) * gamma + beta
    if act == "gelu":
        out = _gelu(out)
    return out


def _f32(ref):
    return ref[...].astype(jnp.float32)


# --------------------------------------------------------------------------- #
# kernel bodies
# --------------------------------------------------------------------------- #

def _pe_ln_kernel(x_ref, pe_ref, g_ref, b_ref, o_ref, *, eps):
    # Fused: out = LayerNorm(x + pe)   (dropout = identity in eval mode).
    y = _f32(x_ref) + _f32(pe_ref)
    o_ref[...] = _layernorm(y, _f32(g_ref), _f32(b_ref), eps, None).astype(o_ref.dtype)


def _attn_block_kernel(x_ref, wqkv_ref, bqkv_ref, wo_ref, bo_ref, g_ref, b_ref,
                       o_ref, ctx_ref, *, num_heads, head_dim, d_model, scale, eps):
    # One batch per grid step: norm1(x + Wo @ MHA(Wqkv @ x)).
    # TODO(synk): src_key_padding_mask (from `lengths`) would add -inf to `s` here.
    x = x_ref[...]                                                    # (S, D) bf16
    qkv = jnp.dot(x, wqkv_ref[...], preferred_element_type=jnp.float32)
    qkv = (qkv + _f32(bqkv_ref)).astype(x.dtype)                      # (S, 3D) bf16
    for h in range(num_heads):                                        # static unroll
        q = qkv[:, h * head_dim:(h + 1) * head_dim]
        k = qkv[:, d_model + h * head_dim:d_model + (h + 1) * head_dim]
        v = qkv[:, 2 * d_model + h * head_dim:2 * d_model + (h + 1) * head_dim]
        s = jax.lax.dot_general(q, k, (((1,), (1,)), ((), ())),
                                preferred_element_type=jnp.float32) * scale   # (S, S)
        m = jnp.max(s, axis=-1, keepdims=True)
        e = jnp.exp(s - m)
        attn = e * pl.reciprocal(jnp.sum(e, axis=-1, keepdims=True), approx=True)
        ctx_ref[:, h * head_dim:(h + 1) * head_dim] = jnp.dot(
            attn.astype(x.dtype), v, preferred_element_type=jnp.float32)
    attn_out = jnp.dot(ctx_ref[...].astype(x.dtype), wo_ref[...],
                       preferred_element_type=jnp.float32) + _f32(bo_ref)
    y = attn_out + x.astype(jnp.float32)                              # residual
    o_ref[...] = _layernorm(y, _f32(g_ref), _f32(b_ref), eps, None).astype(o_ref.dtype)


def _ffn_kernel(x_ref, w1_ref, b1_ref, w2_ref, b2_ref, g_ref, b_ref, o_ref, *, eps):
    # Fused: norm2(x + ff2(relu(ff1(x)))); the (tm, F) intermediate never hits HBM.
    x = x_ref[...]
    h = jnp.dot(x, w1_ref[...], preferred_element_type=jnp.float32) + _f32(b1_ref)
    h = jnp.maximum(h, 0.0).astype(x.dtype)              # relu; back to bf16 for MXU
    y = jnp.dot(h, w2_ref[...], preferred_element_type=jnp.float32) + _f32(b2_ref)
    y = y + x.astype(jnp.float32)                        # residual
    o_ref[...] = _layernorm(y, _f32(g_ref), _f32(b_ref), eps, None).astype(o_ref.dtype)


def _linear_ln_kernel(x_ref, w_ref, b_ref, g_ref, be_ref, o_ref, *, eps, post_act):
    # Fused: post_act(LayerNorm(x @ w + b)).
    y = jnp.dot(x_ref[...], w_ref[...], preferred_element_type=jnp.float32) + _f32(b_ref)
    o_ref[...] = _layernorm(y, _f32(g_ref), _f32(be_ref), eps, post_act).astype(o_ref.dtype)


def _rb_tail_kernel(h_ref, w_ref, b_ref, res_ref, g2_ref, be2_ref, g3_ref, be3_ref,
                    o_ref, *, eps):
    # Fused ResidualBlock tail: gelu(ln3(ln2(h @ w + b) + residual)).
    y = jnp.dot(h_ref[...], w_ref[...], preferred_element_type=jnp.float32) + _f32(b_ref)
    y = _layernorm(y, _f32(g2_ref), _f32(be2_ref), eps, None)
    y = y + _f32(res_ref)
    o_ref[...] = _layernorm(y, _f32(g3_ref), _f32(be3_ref), eps, "gelu").astype(o_ref.dtype)


# --------------------------------------------------------------------------- #
# pallas_call wrappers
# --------------------------------------------------------------------------- #

def pallas_pe_ln(x, pe_table, gamma, beta, *, batch, seq, eps=LN_EPS):
    """out = LayerNorm(x + pe[:seq]) on the batch-major (B*S, D) layout."""
    rows, d = x.shape
    return pl.pallas_call(
        functools.partial(_pe_ln_kernel, eps=eps),
        out_shape=jax.ShapeDtypeStruct((rows, d), x.dtype),
        grid=(batch,),
        in_specs=[
            _rows_spec(seq, d),           # rows of batch b
            _const_spec((seq, d)),        # pe[:seq] read straight from (max_len, D) table
            _const_spec((1, d)),
            _const_spec((1, d)),
        ],
        out_specs=_rows_spec(seq, d),
        compiler_params=pltpu.CompilerParams(dimension_semantics=("parallel",)),
    )(x, pe_table, gamma, beta)


def pallas_attention_block(x, wqkv, bqkv, wo, bo, gamma, beta, *, batch, seq,
                           num_heads, eps=LN_EPS):
    """norm1(x + out_proj(MHA(in_proj(x)))) for one encoder layer, gridded over batch."""
    rows, d = x.shape
    head_dim = d // num_heads
    return pl.pallas_call(
        functools.partial(_attn_block_kernel, num_heads=num_heads, head_dim=head_dim,
                          d_model=d, scale=1.0 / math.sqrt(head_dim), eps=eps),
        out_shape=jax.ShapeDtypeStruct((rows, d), x.dtype),
        grid=(batch,),
        in_specs=[
            _rows_spec(seq, d),
            _const_spec((d, 3 * d)),
            _const_spec((1, 3 * d)),
            _const_spec((d, d)),
            _const_spec((1, d)),
            _const_spec((1, d)),
            _const_spec((1, d)),
        ],
        out_specs=_rows_spec(seq, d),
        scratch_shapes=[pltpu.VMEM((seq, d), jnp.float32)],   # per-head ctx assembly
        compiler_params=pltpu.CompilerParams(dimension_semantics=("parallel",)),
    )(x, wqkv, bqkv, wo, bo, gamma, beta)


def pallas_ffn(x, w1, b1, w2, b2, gamma, beta, *, eps=LN_EPS):
    """norm2(x + ff2(relu(ff1(x)))), row-tiled; FF intermediate stays in VMEM."""
    rows, d = x.shape
    f = w1.shape[1]
    tm = _row_tile(rows, (d + f) * x.dtype.itemsize)
    return pl.pallas_call(
        functools.partial(_ffn_kernel, eps=eps),
        out_shape=jax.ShapeDtypeStruct((rows, d), x.dtype),
        grid=(rows // tm,),
        in_specs=[
            _rows_spec(tm, d),
            _const_spec((d, f)),
            _const_spec((1, f)),
            _const_spec((f, d)),
            _const_spec((1, d)),
            _const_spec((1, d)),
            _const_spec((1, d)),
        ],
        out_specs=_rows_spec(tm, d),
        compiler_params=pltpu.CompilerParams(dimension_semantics=("parallel",)),
    )(x, w1, b1, w2, b2, gamma, beta)


def pallas_linear_ln(x, w, b, gamma, beta, *, post_act=None, eps=LN_EPS):
    """post_act(LayerNorm(x @ w + b)) -- LN (+GELU) fused in the matmul epilogue."""
    rows, k = x.shape
    n = w.shape[1]
    tm = _row_tile(rows, (k + n) * x.dtype.itemsize)
    return pl.pallas_call(
        functools.partial(_linear_ln_kernel, eps=eps, post_act=post_act),
        out_shape=jax.ShapeDtypeStruct((rows, n), x.dtype),
        grid=(rows // tm,),
        in_specs=[
            _rows_spec(tm, k),
            _const_spec((k, n)),
            _const_spec((1, n)),
            _const_spec((1, n)),
            _const_spec((1, n)),
        ],
        out_specs=_rows_spec(tm, n),
        compiler_params=pltpu.CompilerParams(dimension_semantics=("parallel",)),
    )(x, w, b, gamma, beta)


def pallas_rb_tail(h, w, b, residual, g2, b2, g3, b3, *, eps=LN_EPS):
    """gelu(ln3(ln2(h @ w + b) + residual)) -- ResidualBlock tail in one kernel."""
    rows, k = h.shape
    n = w.shape[1]
    tm = _row_tile(rows, (k + 2 * n) * h.dtype.itemsize)
    return pl.pallas_call(
        functools.partial(_rb_tail_kernel, eps=eps),
        out_shape=jax.ShapeDtypeStruct((rows, n), h.dtype),
        grid=(rows // tm,),
        in_specs=[
            _rows_spec(tm, k),
            _const_spec((k, n)),
            _const_spec((1, n)),
            _rows_spec(tm, n),
            _const_spec((1, n)),
            _const_spec((1, n)),
            _const_spec((1, n)),
            _const_spec((1, n)),
        ],
        out_specs=_rows_spec(tm, n),
        compiler_params=pltpu.CompilerParams(dimension_semantics=("parallel",)),
    )(h, w, b, residual, g2, b2, g3, b3)


# --------------------------------------------------------------------------- #
# parameters
# --------------------------------------------------------------------------- #

def make_positional_table(max_len, d_model, dtype=jnp.float32):
    pos = jnp.arange(max_len, dtype=jnp.float32)[:, None]
    div = jnp.exp(jnp.arange(0, d_model, 2, dtype=jnp.float32)
                  * (-math.log(10000.0) / d_model))
    ang = pos * div
    pe = jnp.zeros((max_len, d_model), jnp.float32)
    pe = pe.at[:, 0::2].set(jnp.sin(ang))
    pe = pe.at[:, 1::2].set(jnp.cos(ang))
    return pe.astype(dtype)


def _linear_params(key, fan_in, fan_out):
    kw, kb = jax.random.split(key)
    # Weights stored already transposed (in, out), in bf16: kernels compute x @ w + b.
    w = (jax.random.normal(kw, (fan_in, fan_out), jnp.float32)
         / math.sqrt(fan_in)).astype(ACT_DTYPE)
    b = 0.05 * jax.random.normal(kb, (1, fan_out), jnp.float32)
    return w, b


def _ln_params(key, d):
    kg, kb = jax.random.split(key)
    g = 1.0 + 0.1 * jax.random.normal(kg, (1, d), jnp.float32)
    b = 0.05 * jax.random.normal(kb, (1, d), jnp.float32)
    return g, b


def init_params(key, cfg):
    d = cfg["hidden_size"]
    f = cfg["dim_feedforward"]
    keys = iter(jax.random.split(key, 64))
    params = {"pe": make_positional_table(cfg["max_len"], d)}
    params["ln0_g"], params["ln0_b"] = _ln_params(next(keys), d)
    layers = []
    for _ in range(cfg["num_layers"]):
        p = {}
        p["in_proj_w"], p["in_proj_b"] = _linear_params(next(keys), d, 3 * d)
        p["out_proj_w"], p["out_proj_b"] = _linear_params(next(keys), d, d)
        p["ff1_w"], p["ff1_b"] = _linear_params(next(keys), d, f)
        p["ff2_w"], p["ff2_b"] = _linear_params(next(keys), f, d)
        p["norm1_g"], p["norm1_b"] = _ln_params(next(keys), d)
        p["norm2_g"], p["norm2_b"] = _ln_params(next(keys), d)
        layers.append(p)
    params["layers"] = layers
    rb = {}
    rb["fc1_w"], rb["fc1_b"] = _linear_params(next(keys), d, d)
    rb["fc2_w"], rb["fc2_b"] = _linear_params(next(keys), d, d)
    rb["ln1_g"], rb["ln1_b"] = _ln_params(next(keys), d)
    rb["ln2_g"], rb["ln2_b"] = _ln_params(next(keys), d)
    rb["ln3_g"], rb["ln3_b"] = _ln_params(next(keys), d)
    params["residual_block"] = rb       # one ResidualBlock shared across all layers
    return params


# --------------------------------------------------------------------------- #
# full forward (eval mode)
# --------------------------------------------------------------------------- #

def transformer_encoder_forward(params, src_emb, cfg, lengths=None):
    if src_emb.ndim == 4:   # mirrors torch: permute(1,0,2,3) then view(s0, s1, -1)
        src_emb = jnp.transpose(src_emb, (1, 0, 2, 3))
        src_emb = src_emb.reshape(src_emb.shape[0], src_emb.shape[1], -1)
    if src_emb.ndim != 3:
        raise ValueError(f"Expected src_emb to have 3 dimensions, got {src_emb.ndim}")
    # TODO(synk): lengths -> src_key_padding_mask (additive -inf before the softmax).

    S, B, D = src_emb.shape
    H = cfg["num_heads"]
    assert D % H == 0
    assert S % 8 == 0, "TODO(synk): pad ragged sequences to a sublane (8) multiple"

    # Batch-major, lane-dense (B*S, D) bf16 layout for every kernel; the only XLA
    # relayouts in the whole forward are this transpose and the final output transpose.
    x = jnp.transpose(src_emb, (1, 0, 2)).reshape(B * S, D).astype(ACT_DTYPE)

    # layer_norm(dropout(pos_encoder(x))) -- dropout = identity; PE add fused with LN.
    x = pallas_pe_ln(x, params["pe"], params["ln0_g"], params["ln0_b"], batch=B, seq=S)

    rb = params["residual_block"]
    layer_means = []
    for p in params["layers"]:
        # ---- nn.TransformerEncoderLayer (post-norm, relu): 2 fused kernels ----
        x = pallas_attention_block(x, p["in_proj_w"], p["in_proj_b"],
                                   p["out_proj_w"], p["out_proj_b"],
                                   p["norm1_g"], p["norm1_b"],
                                   batch=B, seq=S, num_heads=H)
        x = pallas_ffn(x, p["ff1_w"], p["ff1_b"], p["ff2_w"], p["ff2_b"],
                       p["norm2_g"], p["norm2_b"])
        # ---- shared ResidualBlock: 2 fused kernels ----
        h = pallas_linear_ln(x, rb["fc1_w"], rb["fc1_b"], rb["ln1_g"], rb["ln1_b"],
                             post_act="gelu")
        x = pallas_rb_tail(h, rb["fc2_w"], rb["fc2_b"], x,
                           rb["ln2_g"], rb["ln2_b"], rb["ln3_g"], rb["ln3_b"])
        # Per-layer mean over the sequence: trivially small, left to XLA.
        layer_means.append(x.reshape(B, S, D).astype(jnp.float32).mean(axis=1))

    memory_bank = jnp.transpose(x.reshape(B, S, D), (1, 0, 2))     # (S, B, D)
    all_layer_memory_bank = jnp.stack(layer_means, axis=0)         # (L, B, D)
    return memory_bank, all_layer_memory_bank


# --------------------------------------------------------------------------- #
# pure-JAX reference (same params, same bf16 storage path, no Pallas)
# --------------------------------------------------------------------------- #

def reference_forward(params, src_emb, cfg):
    f32, bf = jnp.float32, ACT_DTYPE
    S, B, D = src_emb.shape
    H = cfg["num_heads"]
    hd = D // H

    def ln(y, g, b, act=None):
        return _layernorm(y, g.astype(f32), b.astype(f32), LN_EPS, act)

    x = jnp.transpose(src_emb, (1, 0, 2)).reshape(B * S, D).astype(bf)
    y = x.astype(f32) + jnp.tile(params["pe"][:S], (B, 1))
    x = ln(y, params["ln0_g"], params["ln0_b"]).astype(bf)

    rb = params["residual_block"]
    means = []
    for p in params["layers"]:
        xb = x.reshape(B, S, D)
        qkv = (jnp.einsum("bsd,de->bse", xb, p["in_proj_w"],
                          preferred_element_type=f32) + p["in_proj_b"]).astype(bf)
        heads = []
        for h in range(H):
            q = qkv[:, :, h * hd:(h + 1) * hd]
            k = qkv[:, :, D + h * hd:D + (h + 1) * hd]
            v = qkv[:, :, 2 * D + h * hd:2 * D + (h + 1) * hd]
            s = jnp.einsum("bqd,bkd->bqk", q, k,
                           preferred_element_type=f32) * (1.0 / math.sqrt(hd))
            e = jnp.exp(s - jnp.max(s, axis=-1, keepdims=True))
            attn = e / jnp.sum(e, axis=-1, keepdims=True)
            heads.append(jnp.einsum("bqk,bkd->bqd", attn.astype(bf), v,
                                    preferred_element_type=f32))
        ctx = jnp.concatenate(heads, axis=-1).astype(bf)
        attn_out = jnp.einsum("bsd,de->bse", ctx, p["out_proj_w"],
                              preferred_element_type=f32) + p["out_proj_b"]
        x = ln(attn_out.reshape(B * S, D) + x.astype(f32),
               p["norm1_g"], p["norm1_b"]).astype(bf)

        h1 = jnp.maximum(jnp.dot(x, p["ff1_w"], preferred_element_type=f32)
                         + p["ff1_b"], 0.0).astype(bf)
        y = jnp.dot(h1, p["ff2_w"], preferred_element_type=f32) + p["ff2_b"]
        x = ln(y + x.astype(f32), p["norm2_g"], p["norm2_b"]).astype(bf)

        h2 = ln(jnp.dot(x, rb["fc1_w"], preferred_element_type=f32) + rb["fc1_b"],
                rb["ln1_g"], rb["ln1_b"], act="gelu").astype(bf)
        y = ln(jnp.dot(h2, rb["fc2_w"], preferred_element_type=f32) + rb["fc2_b"],
               rb["ln2_g"], rb["ln2_b"])
        x = ln(y + x.astype(f32), rb["ln3_g"], rb["ln3_b"], act="gelu").astype(bf)

        means.append(x.reshape(B, S, D).astype(f32).mean(axis=1))

    mem = jnp.transpose(x.reshape(B, S, D), (1, 0, 2))
    return mem, jnp.stack(means, axis=0)


# --------------------------------------------------------------------------- #
# main
# --------------------------------------------------------------------------- #

if __name__ == "__main__":
    cfg = {
        "hidden_size": 32,      # d_model          (700 in the original config)
        "num_heads": 4,         #                  (20)
        "num_layers": 2,        #                  (20)
        "dim_feedforward": 64,  #                  (3000)
        "max_len": 64,          #                  (10000)
    }
    seq_len, batch = 8, 2

    root = jax.random.PRNGKey(0)
    k_inp, k_par = jax.random.split(root)
    src_emb = jax.random.normal(k_inp, (seq_len, batch, cfg["hidden_size"]), jnp.float32)
    params = init_params(k_par, cfg)

    fwd = jax.jit(lambda prm, emb: transformer_encoder_forward(prm, emb, cfg))
    memory_bank, all_layer_memory_bank = fwd(params, src_emb)
    memory_bank = jax.block_until_ready(memory_bank)
    all_layer_memory_bank = jax.block_until_ready(all_layer_memory_bank)

    assert memory_bank.shape == (seq_len, batch, cfg["hidden_size"])
    assert all_layer_memory_bank.shape == (cfg["num_layers"], batch, cfg["hidden_size"])

    ref_mem, ref_all = reference_forward(params, src_emb, cfg)
    # bf16 storage / bf16-MXU path on both sides; tolerance sized for bf16 rounding.
    assert bool(jnp.allclose(memory_bank.astype(jnp.float32),
                             ref_mem.astype(jnp.float32), rtol=3e-2, atol=3e-2))
    assert bool(jnp.allclose(all_layer_memory_bank, ref_all, rtol=3e-2, atol=3e-2))

    print("KERNEL_OK")
</pallas_src>

<mosaic_0001>
module attributes {stable_mosaic.version = 11 : i64} {
  func.func @_pe_ln_kernel(%arg0: i32, %arg1: memref<8x32xbf16, #tpu.memory_space<vmem>>, %arg2: memref<8x32xf32, #tpu.memory_space<vmem>>, %arg3: memref<1x32xf32, #tpu.memory_space<vmem>>, %arg4: memref<1x32xf32, #tpu.memory_space<vmem>>, %arg5: memref<8x32xbf16, #tpu.memory_space<vmem>>) attributes {dimension_semantics = [#tpu.dimension_semantics<parallel>], iteration_bounds = array<i64: 2>, scalar_prefetch = 0 : i64, scratch_operands = 0 : i64, tpu.core_type = #tpu.core_type<tc>, window_params = [{transform_indices = @transform_0, window_bounds = array<i64: 8, 32>}, {transform_indices = @transform_1, window_bounds = array<i64: 8, 32>}, {pipeline_mode = #tpu.pipeline_mode<synchronous>, transform_indices = @transform_2, window_bounds = array<i64: 1, 32>}, {pipeline_mode = #tpu.pipeline_mode<synchronous>, transform_indices = @transform_3, window_bounds = array<i64: 1, 32>}, {transform_indices = @transform_4, window_bounds = array<i64: 8, 32>}]} {
    %c0 = arith.constant 0 : index
    %c0_0 = arith.constant 0 : index
    %0 = vector.load %arg1[%c0, %c0_0] : memref<8x32xbf16, #tpu.memory_space<vmem>>, vector<8x32xbf16>
    %1 = arith.extf %0 : vector<8x32xbf16> to vector<8x32xf32>
    %c0_1 = arith.constant 0 : index
    %c0_2 = arith.constant 0 : index
    %2 = vector.load %arg2[%c0_1, %c0_2] : memref<8x32xf32, #tpu.memory_space<vmem>>, vector<8x32xf32>
    %3 = arith.addf %1, %2 : vector<8x32xf32>
    %c0_3 = arith.constant 0 : index
    %c0_4 = arith.constant 0 : index
    %4 = vector.load %arg3[%c0_3, %c0_4] : memref<1x32xf32, #tpu.memory_space<vmem>>, vector<1x32xf32>
    %c0_5 = arith.constant 0 : index
    %c0_6 = arith.constant 0 : index
    %5 = vector.load %arg4[%c0_5, %c0_6] : memref<1x32xf32, #tpu.memory_space<vmem>>, vector<1x32xf32>
    %cst = arith.constant dense<0.000000e+00> : vector<8xf32>
    %6 = vector.multi_reduction <add>, %3, %cst [1] : vector<8x32xf32> to vector<8xf32>
    %7 = vector.shape_cast %6 : vector<8xf32> to vector<8x1xf32>
    %cst_7 = arith.constant 3.200000e+01 : f32
    %8 = vector.broadcast %cst_7 : f32 to vector<8x1xf32>
    %9 = arith.divf %7, %8 : vector<8x1xf32>
    %10 = vector.broadcast %9 : vector<8x1xf32> to vector<8x32xf32>
    %11 = arith.subf %3, %10 : vector<8x32xf32>
    %12 = arith.mulf %11, %11 : vector<8x32xf32>
    %cst_8 = arith.constant dense<0.000000e+00> : vector<8xf32>
    %13 = vector.multi_reduction <add>, %12, %cst_8 [1] : vector<8x32xf32> to vector<8xf32>
    %14 = vector.shape_cast %13 : vector<8xf32> to vector<8x1xf32>
    %cst_9 = arith.constant 3.200000e+01 : f32
    %15 = vector.broadcast %cst_9 : f32 to vector<8x1xf32>
    %16 = arith.divf %14, %15 : vector<8x1xf32>
    %cst_10 = arith.constant 9.99999974E-6 : f32
    %17 = vector.broadcast %cst_10 : f32 to vector<8x1xf32>
    %18 = arith.addf %16, %17 : vector<8x1xf32>
    %19 = math.rsqrt %18 : vector<8x1xf32>
    %20 = vector.broadcast %19 : vector<8x1xf32> to vector<8x32xf32>
    %21 = arith.mulf %11, %20 : vector<8x32xf32>
    %22 = vector.broadcast %4 : vector<1x32xf32> to vector<8x32xf32>
    %23 = arith.mulf %21, %22 : vector<8x32xf32>
    %24 = vector.broadcast %5 : vector<1x32xf32> to vector<8x32xf32>
    %25 = arith.addf %23, %24 : vector<8x32xf32>
    %26 = arith.truncf %25 : vector<8x32xf32> to vector<8x32xbf16>
    %c0_11 = arith.constant 0 : index
    %c0_12 = arith.constant 0 : index
    %27 = vector.load %arg5[%c0_11, %c0_12] : memref<8x32xbf16, #tpu.memory_space<vmem>>, vector<8x32xbf16>
    tpu.vector_store %arg5[%c0_11, %c0_12], %26 {strides = array<i32>} : memref<8x32xbf16, #tpu.memory_space<vmem>>, vector<8x32xbf16>,
    return
  }
  func.func @transform_0(%arg0: i32) -> (i32, i32) {
    %c0_i32 = arith.constant 0 : i32
    %c0_i32_0 = arith.constant 0 : i32
    return %arg0, %c0_i32 : i32, i32
  }
  func.func @transform_1(%arg0: i32) -> (i32, i32) {
    %c0_i32 = arith.constant 0 : i32
    %c0_i32_0 = arith.constant 0 : i32
    %c0_i32_1 = arith.constant 0 : i32
    return %c0_i32, %c0_i32_0 : i32, i32
  }
  func.func @transform_2(%arg0: i32) -> (i32, i32) {
    %c0_i32 = arith.constant 0 : i32
    %c0_i32_0 = arith.constant 0 : i32
    %c0_i32_1 = arith.constant 0 : i32
    return %c0_i32, %c0_i32_0 : i32, i32
  }
  func.func @transform_3(%arg0: i32) -> (i32, i32) {
    %c0_i32 = arith.constant 0 : i32
    %c0_i32_0 = arith.constant 0 : i32
    %c0_i32_1 = arith.constant 0 : i32
    return %c0_i32, %c0_i32_0 : i32, i32
  }
  func.func @transform_4(%arg0: i32) -> (i32, i32) {
    %c0_i32 = arith.constant 0 : i32
    %c0_i32_0 = arith.constant 0 : i32
    return %arg0, %c0_i32 : i32, i32
  }
}

module attributes {stable_mosaic.version = 11 : i64} {
  func.func @_attn_block_kernel(%arg0: i32, %arg1: memref<8x32xbf16, #tpu.memory_space<vmem>>, %arg2: memref<32x96xbf16, #tpu.memory_space<vmem>>, %arg3: memref<1x96xf32, #tpu.memory_space<vmem>>, %arg4: memref<32x32xbf16, #tpu.memory_space<vmem>>, %arg5: memref<1x32xf32, #tpu.memory_space<vmem>>, %arg6: memref<1x32xf32, #tpu.memory_space<vmem>>, %arg7: memref<1x32xf32, #tpu.memory_space<vmem>>, %arg8: memref<8x32xbf16, #tpu.memory_space<vmem>>, %arg9: memref<8x32xf32, #tpu.memory_space<vmem>>) attributes {dimension_semantics = [#tpu.dimension_semantics<parallel>], iteration_bounds = array<i64: 2>, scalar_prefetch = 0 : i64, scratch_operands = 1 : i64, tpu.core_type = #tpu.core_type<tc>, window_params = [{transform_indices = @transform_0, window_bounds = array<i64: 8, 32>}, {pipeline_mode = #tpu.pipeline_mode<synchronous>, transform_indices = @transform_1, window_bounds = array<i64: 32, 96>}, {pipeline_mode = #tpu.pipeline_mode<synchronous>, transform_indices = @transform_2, window_bounds = array<i64: 1, 96>}, {pipeline_mode = #tpu.pipeline_mode<synchronous>, transform_indices = @transform_3, window_bounds = array<i64: 32, 32>}, {pipeline_mode = #tpu.pipeline_mode<synchronous>, transform_indices = @transform_4, window_bounds = array<i64: 1, 32>}, {pipeline_mode = #tpu.pipeline_mode<synchronous>, transform_indices = @transform_5, window_bounds = array<i64: 1, 32>}, {pipeline_mode = #tpu.pipeline_mode<synchronous>, transform_indices = @transform_6, window_bounds = array<i64: 1, 32>}, {transform_indices = @transform_7, window_bounds = array<i64: 8, 32>}]} {
    %c0 = arith.constant 0 : index
    %c0_0 = arith.constant 0 : index
    %0 = vector.load %arg1[%c0, %c0_0] : memref<8x32xbf16, #tpu.memory_space<vmem>>, vector<8x32xbf16>
    %c0_1 = arith.constant 0 : index
    %c0_2 = arith.constant 0 : index
    %1 = vector.load %arg2[%c0_1, %c0_2] : memref<32x96xbf16, #tpu.memory_space<vmem>>, vector<32x96xbf16>
    %cst = arith.constant dense<0.000000e+00> : vector<8x96xf32>
    %2 = tpu.matmul %0, %1, %cst {dimension_numbers = #tpu.dot_dimension_numbers<[1], [0], [0], [1], [0, 0, 1, 1], [], []>} : vector<8x32xbf16>, vector<32x96xbf16>, vector<8x96xf32> -> vector<8x96xf32>
    %c0_3 = arith.constant 0 : index
    %c0_4 = arith.constant 0 : index
    %3 = vector.load %arg3[%c0_3, %c0_4] : memref<1x96xf32, #tpu.memory_space<vmem>>, vector<1x96xf32>
    %4 = vector.broadcast %3 : vector<1x96xf32> to vector<8x96xf32>
    %5 = arith.addf %2, %4 : vector<8x96xf32>
    %6 = arith.truncf %5 : vector<8x96xf32> to vector<8x96xbf16>
    %7 = vector.extract_strided_slice %6 {offsets = [0, 0], sizes = [8, 8], strides = [1, 1]} : vector<8x96xbf16> to vector<8x8xbf16>
    %8 = vector.extract_strided_slice %6 {offsets = [0, 32], sizes = [8, 8], strides = [1, 1]} : vector<8x96xbf16> to vector<8x8xbf16>
    %9 = vector.extract_strided_slice %6 {offsets = [0, 64], sizes = [8, 8], strides = [1, 1]} : vector<8x96xbf16> to vector<8x8xbf16>
    %cst_5 = arith.constant dense<0.000000e+00> : vector<8x8xf32>
    %10 = tpu.matmul %7, %8, %cst_5 {dimension_numbers = #tpu.dot_dimension_numbers<[1], [1], [0], [0], [0, 0, 1, 0], [], []>} : vector<8x8xbf16>, vector<8x8xbf16>, vector<8x8xf32> -> vector<8x8xf32>
    %cst_6 = arith.constant 0.353553385 : f32
    %11 = vector.broadcast %cst_6 : f32 to vector<8x8xf32>
    %12 = arith.mulf %10, %11 : vector<8x8xf32>
    %cst_7 = arith.constant dense<0xFF800000> : vector<8xf32>
    %13 = vector.multi_reduction <maximumf>, %12, %cst_7 [1] : vector<8x8xf32> to vector<8xf32>
    %14 = vector.shape_cast %13 : vector<8xf32> to vector<8x1xf32>
    %15 = vector.broadcast %14 : vector<8x1xf32> to vector<8x8xf32>
    %16 = arith.subf %12, %15 : vector<8x8xf32>
    %17 = math.exp %16 : vector<8x8xf32>
    %cst_8 = arith.constant dense<0.000000e+00> : vector<8xf32>
    %18 = vector.multi_reduction <add>, %17, %cst_8 [1] : vector<8x8xf32> to vector<8xf32>
    %19 = vector.shape_cast %18 : vector<8xf32> to vector<8x1xf32>
    %20 = tpu.reciprocal %19 {approx = true} : vector<8x1xf32> -> vector<8x1xf32>
    %21 = vector.broadcast %20 : vector<8x1xf32> to vector<8x8xf32>
    %22 = arith.mulf %17, %21 : vector<8x8xf32>
    %23 = arith.truncf %22 : vector<8x8xf32> to vector<8x8xbf16>
    %cst_9 = arith.constant dense<0.000000e+00> : vector<8x8xf32>
    %24 = tpu.matmul %23, %9, %cst_9 {dimension_numbers = #tpu.dot_dimension_numbers<[1], [0], [0], [1], [0, 0, 1, 1], [], []>} : vector<8x8xbf16>, vector<8x8xbf16>, vector<8x8xf32> -> vector<8x8xf32>
    %c0_10 = arith.constant 0 : index
    %c0_11 = arith.constant 0 : index
    %25 = vector.load %arg9[%c0_10, %c0_11] : memref<8x32xf32, #tpu.memory_space<vmem>>, vector<8x8xf32>
    tpu.vector_store %arg9[%c0_10, %c0_11], %24 {strides = array<i32>} : memref<8x32xf32, #tpu.memory_space<vmem>>, vector<8x8xf32>,
    %26 = vector.extract_strided_slice %6 {offsets = [0, 8], sizes = [8, 8], strides = [1, 1]} : vector<8x96xbf16> to vector<8x8xbf16>
    %27 = vector.extract_strided_slice %6 {offsets = [0, 40], sizes = [8, 8], strides = [1, 1]} : vector<8x96xbf16> to vector<8x8xbf16>
    %28 = vector.extract_strided_slice %6 {offsets = [0, 72], sizes = [8, 8], strides = [1, 1]} : vector<8x96xbf16> to vector<8x8xbf16>
    %cst_12 = arith.constant dense<0.000000e+00> : vector<8x8xf32>
    %29 = tpu.matmul %26, %27, %cst_12 {dimension_numbers = #tpu.dot_dimension_numbers<[1], [1], [0], [0], [0, 0, 1, 0], [], []>} : vector<8x8xbf16>, vector<8x8xbf16>, vector<8x8xf32> -> vector<8x8xf32>
    %cst_13 = arith.constant 0.353553385 : f32
    %30 = vector.broadcast %cst_13 : f32 to vector<8x8xf32>
    %31 = arith.mulf %29, %30 : vector<8x8xf32>
    %cst_14 = arith.constant dense<0xFF800000> : vector<8xf32>
    %32 = vector.multi_reduction <maximumf>, %31, %cst_14 [1] : vector<8x8xf32> to vector<8xf32>
    %33 = vector.shape_cast %32 : vector<8xf32> to vector<8x1xf32>
    %34 = vector.broadcast %33 : vector<8x1xf32> to vector<8x8xf32>
    %35 = arith.subf %31, %34 : vector<8x8xf32>
    %36 = math.exp %35 : vector<8x8xf32>
    %cst_15 = arith.constant dense<0.000000e+00> : vector<8xf32>
    %37 = vector.multi_reduction <add>, %36, %cst_15 [1] : vector<8x8xf32> to vector<8xf32>
    %38 = vector.shape_cast %37 : vector<8xf32> to vector<8x1xf32>
    %39 = tpu.reciprocal %38 {approx = true} : vector<8x1xf32> -> vector<8x1xf32>
    %40 = vector.broadcast %39 : vector<8x1xf32> to vector<8x8xf32>
    %41 = arith.mulf %36, %40 : vector<8x8xf32>
    %42 = arith.truncf %41 : vector<8x8xf32> to vector<8x8xbf16>
    %cst_16 = arith.constant dense<0.000000e+00> : vector<8x8xf32>
    %43 = tpu.matmul %42, %28, %cst_16 {dimension_numbers = #tpu.dot_dimension_numbers<[1], [0], [0], [1], [0, 0, 1, 1], [], []>} : vector<8x8xbf16>, vector<8x8xbf16>, vector<8x8xf32> -> vector<8x8xf32>
    %c0_17 = arith.constant 0 : index
    %c8 = arith.constant 8 : index
    %44 = vector.load %arg9[%c0_17, %c8] : memref<8x32xf32, #tpu.memory_space<vmem>>, vector<8x8xf32>
    tpu.vector_store %arg9[%c0_17, %c8], %43 {strides = array<i32>} : memref<8x32xf32, #tpu.memory_space<vmem>>, vector<8x8xf32>,
    %45 = vector.extract_strided_slice %6 {offsets = [0, 16], sizes = [8, 8], strides = [1, 1]} : vector<8x96xbf16> to vector<8x8xbf16>
    %46 = vector.extract_strided_slice %6 {offsets = [0, 48], sizes = [8, 8], strides = [1, 1]} : vector<8x96xbf16> to vector<8x8xbf16>
    %47 = vector.extract_strided_slice %6 {offsets = [0, 80], sizes = [8, 8], strides = [1, 1]} : vector<8x96xbf16> to vector<8x8xbf16>
    %cst_18 = arith.constant dense<0.000000e+00> : vector<8x8xf32>
    %48 = tpu.matmul %45, %46, %cst_18 {dimension_numbers = #tpu.dot_dimension_numbers<[1], [1], [0], [0], [0, 0, 1, 0], [], []>} : vector<8x8xbf16>, vector<8x8xbf16>, vector<8x8xf32> -> vector<8x8xf32>
    %cst_19 = arith.constant 0.353553385 : f32
    %49 = vector.broadcast %cst_19 : f32 to vector<8x8xf32>
    %50 = arith.mulf %48, %49 : vector<8x8xf32>
    %cst_20 = arith.constant dense<0xFF800000> : vector<8xf32>
    %51 = vector.multi_reduction <maximumf>, %50, %cst_20 [1] : vector<8x8xf32> to vector<8xf32>
    %52 = vector.shape_cast %51 : vector<8xf32> to vector<8x1xf32>
    %53 = vector.broadcast %52 : vector<8x1xf32> to vector<8x8xf32>
    %54 = arith.subf %50, %53 : vector<8x8xf32>
    %55 = math.exp %54 : vector<8x8xf32>
    %cst_21 = arith.constant dense<0.000000e+00> : vector<8xf32>
    %56 = vector.multi_reduction <add>, %55, %cst_21 [1] : vector<8x8xf32> to vector<8xf32>
    %57 = vector.shape_cast %56 : vector<8xf32> to vector<8x1xf32>
    %58 = tpu.reciprocal %57 {approx = true} : vector<8x1xf32> -> vector<8x1xf32>
    %59 = vector.broadcast %58 : vector<8x1xf32> to vector<8x8xf32>
    %60 = arith.mulf %55, %59 : vector<8x8xf32>
    %61 = arith.truncf %60 : vector<8x8xf32> to vector<8x8xbf16>
    %cst_22 = arith.constant dense<0.000000e+00> : vector<8x8xf32>
    %62 = tpu.matmul %61, %47, %cst_22 {dimension_numbers = #tpu.dot_dimension_numbers<[1], [0], [0], [1], [0, 0, 1, 1], [], []>} : vector<8x8xbf16>, vector<8x8xbf16>, vector<8x8xf32> -> vector<8x8xf32>
    %c0_23 = arith.constant 0 : index
    %c16 = arith.constant 16 : index
    %63 = vector.load %arg9[%c0_23, %c16] : memref<8x32xf32, #tpu.memory_space<vmem>>, vector<8x8xf32>
    tpu.vector_store %arg9[%c0_23, %c16], %62 {strides = array<i32>} : memref<8x32xf32, #tpu.memory_space<vmem>>, vector<8x8xf32>,
    %64 = vector.extract_strided_slice %6 {offsets = [0, 24], sizes = [8, 8], strides = [1, 1]} : vector<8x96xbf16> to vector<8x8xbf16>
    %65 = vector.extract_strided_slice %6 {offsets = [0, 56], sizes = [8, 8], strides = [1, 1]} : vector<8x96xbf16> to vector<8x8xbf16>
    %66 = vector.extract_strided_slice %6 {offsets = [0, 88], sizes = [8, 8], strides = [1, 1]} : vector<8x96xbf16> to vector<8x8xbf16>
    %cst_24 = arith.constant dense<0.000000e+00> : vector<8x8xf32>
    %67 = tpu.matmul %64, %65, %cst_24 {dimension_numbers = #tpu.dot_dimension_numbers<[1], [1], [0], [0], [0, 0, 1, 0], [], []>} : vector<8x8xbf16>, vector<8x8xbf16>, vector<8x8xf32> -> vector<8x8xf32>
    %cst_25 = arith.constant 0.353553385 : f32
    %68 = vector.broadcast %cst_25 : f32 to vector<8x8xf32>
    %69 = arith.mulf %67, %68 : vector<8x8xf32>
    %cst_26 = arith.constant dense<0xFF800000> : vector<8xf32>
    %70 = vector.multi_reduction <maximumf>, %69, %cst_26 [1] : vector<8x8xf32> to vector<8xf32>
    %71 = vector.shape_cast %70 : vector<8xf32> to vector<8x1xf32>
    %72 = vector.broadcast %71 : vector<8x1xf32> to vector<8x8xf32>
    %73 = arith.subf %69, %72 : vector<8x8xf32>
    %74 = math.exp %73 : vector<8x8xf32>
    %cst_27 = arith.constant dense<0.000000e+00> : vector<8xf32>
    %75 = vector.multi_reduction <add>, %74, %cst_27 [1] : vector<8x8xf32> to vector<8xf32>
    %76 = vector.shape_cast %75 : vector<8xf32> to vector<8x1xf32>
    %77 = tpu.reciprocal %76 {approx = true} : vector<8x1xf32> -> vector<8x1xf32>
    %78 = vector.broadcast %77 : vector<8x1xf32> to vector<8x8xf32>
    %79 = arith.mulf %74, %78 : vector<8x8xf32>
    %80 = arith.truncf %79 : vector<8x8xf32> to vector<8x8xbf16>
    %cst_28 = arith.constant dense<0.000000e+00> : vector<8x8xf32>
    %81 = tpu.matmul %80, %66, %cst_28 {dimension_numbers = #tpu.dot_dimension_numbers<[1], [0], [0], [1], [0, 0, 1, 1], [], []>} : vector<8x8xbf16>, vector<8x8xbf16>, vector<8x8xf32> -> vector<8x8xf32>
    %c0_29 = arith.constant 0 : index
    %c24 = arith.constant 24 : index
    %82 = vector.load %arg9[%c0_29, %c24] : memref<8x32xf32, #tpu.memory_space<vmem>>, vector<8x8xf32>
    tpu.vector_store %arg9[%c0_29, %c24], %81 {strides = array<i32>} : memref<8x32xf32, #tpu.memory_space<vmem>>, vector<8x8xf32>,
    %c0_30 = arith.constant 0 : index
    %c0_31 = arith.constant 0 : index
    %83 = vector.load %arg9[%c0_30, %c0_31] : memref<8x32xf32, #tpu.memory_space<vmem>>, vector<8x32xf32>
    %84 = arith.truncf %83 : vector<8x32xf32> to vector<8x32xbf16>
    %c0_32 = arith.constant 0 : index
    %c0_33 = arith.constant 0 : index
    %85 = vector.load %arg4[%c0_32, %c0_33] : memref<32x32xbf16, #tpu.memory_space<vmem>>, vector<32x32xbf16>
    %cst_34 = arith.constant dense<0.000000e+00> : vector<8x32xf32>
    %86 = tpu.matmul %84, %85, %cst_34 {dimension_numbers = #tpu.dot_dimension_numbers<[1], [0], [0], [1], [0, 0, 1, 1], [], []>} : vector<8x32xbf16>, vector<32x32xbf16>, vector<8x32xf32> -> vector<8x32xf32>
    %c0_35 = arith.constant 0 : index
    %c0_36 = arith.constant 0 : index
    %87 = vector.load %arg5[%c0_35, %c0_36] : memref<1x32xf32, #tpu.memory_space<vmem>>, vector<1x32xf32>
    %88 = vector.broadcast %87 : vector<1x32xf32> to vector<8x32xf32>
    %89 = arith.addf %86, %88 : vector<8x32xf32>
    %90 = arith.extf %0 : vector<8x32xbf16> to vector<8x32xf32>
    %91 = arith.addf %89, %90 : vector<8x32xf32>
    %c0_37 = arith.constant 0 : index
    %c0_38 = arith.constant 0 : index
    %92 = vector.load %arg6[%c0_37, %c0_38] : memref<1x32xf32, #tpu.memory_space<vmem>>, vector<1x32xf32>
    %c0_39 = arith.constant 0 : index
    %c0_40 = arith.constant 0 : index
    %93 = vector.load %arg7[%c0_39, %c0_40] : memref<1x32xf32, #tpu.memory_space<vmem>>, vector<1x32xf32>
    %cst_41 = arith.constant dense<0.000000e+00> : vector<8xf32>
    %94 = vector.multi_reduction <add>, %91, %cst_41 [1] : vector<8x32xf32> to vector<8xf32>
    %95 = vector.shape_cast %94 : vector<8xf32> to vector<8x1xf32>
    %cst_42 = arith.constant 3.200000e+01 : f32
    %96 = vector.broadcast %cst_42 : f32 to vector<8x1xf32>
    %97 = arith.divf %95, %96 : vector<8x1xf32>
    %98 = vector.broadcast %97 : vector<8x1xf32> to vector<8x32xf32>
    %99 = arith.subf %91, %98 : vector<8x32xf32>
    %100 = arith.mulf %99, %99 : vector<8x32xf32>
    %cst_43 = arith.constant dense<0.000000e+00> : vector<8xf32>
    %101 = vector.multi_reduction <add>, %100, %cst_43 [1] : vector<8x32xf32> to vector<8xf32>
    %102 = vector.shape_cast %101 : vector<8xf32> to vector<8x1xf32>
    %cst_44 = arith.constant 3.200000e+01 : f32
    %103 = vector.broadcast %cst_44 : f32 to vector<8x1xf32>
    %104 = arith.divf %102, %103 : vector<8x1xf32>
    %cst_45 = arith.constant 9.99999974E-6 : f32
    %105 = vector.broadcast %cst_45 : f32 to vector<8x1xf32>
    %106 = arith.addf %104, %105 : vector<8x1xf32>
    %107 = math.rsqrt %106 : vector<8x1xf32>
    %108 = vector.broadcast %107 : vector<8x1xf32> to vector<8x32xf32>
    %109 = arith.mulf %99, %108 : vector<8x32xf32>
    %110 = vector.broadcast %92 : vector<1x32xf32> to vector<8x32xf32>
    %111 = arith.mulf %109, %110 : vector<8x32xf32>
    %112 = vector.broadcast %93 : vector<1x32xf32> to vector<8x32xf32>
    %113 = arith.addf %111, %112 : vector<8x32xf32>
    %114 = arith.truncf %113 : vector<8x32xf32> to vector<8x32xbf16>
    %c0_46 = arith.constant 0 : index
    %c0_47 = arith.constant 0 : index
    %115 = vector.load %arg8[%c0_46, %c0_47] : memref<8x32xbf16, #tpu.memory_space<vmem>>, vector<8x32xbf16>
    tpu.vector_store %arg8[%c0_46, %c0_47], %114 {strides = array<i32>} : memref<8x32xbf16, #tpu.memory_space<vmem>>, vector<8x32xbf16>,
    return
  }
  func.func @transform_0(%arg0: i32) -> (i32, i32) {
    %c0_i32 = arith.constant 0 : i32
    %c0_i32_0 = arith.constant 0 : i32
    return %arg0, %c0_i32 : i32, i32
  }
  func.func @transform_1(%arg0: i32) -> (i32, i32) {
    %c0_i32 = arith.constant 0 : i32
    %c0_i32_0 = arith.constant 0 : i32
    %c0_i32_1 = arith.constant 0 : i32
    return %c0_i32, %c0_i32_0 : i32, i32
  }
  func.func @transform_2(%arg0: i32) -> (i32, i32) {
    %c0_i32 = arith.constant 0 : i32
    %c0_i32_0 = arith.constant 0 : i32
    %c0_i32_1 = arith.constant 0 : i32
    return %c0_i32, %c0_i32_0 : i32, i32
  }
  func.func @transform_3(%arg0: i32) -> (i32, i32) {
    %c0_i32 = arith.constant 0 : i32
    %c0_i32_0 = arith.constant 0 : i32
    %c0_i32_1 = arith.constant 0 : i32
    return %c0_i32, %c0_i32_0 : i32, i32
  }
  func.func @transform_4(%arg0: i32) -> (i32, i32) {
    %c0_i32 = arith.constant 0 : i32
    %c0_i32_0 = arith.constant 0 : i32
    %c0_i32_1 = arith.constant 0 : i32
    return %c0_i32, %c0_i32_0 : i32, i32
  }
  func.func @transform_5(%arg0: i32) -> (i32, i32) {
    %c0_i32 = arith.constant 0 : i32
    %c0_i32_0 = arith.constant 0 : i32
    %c0_i32_1 = arith.constant 0 : i32
    return %c0_i32, %c0_i32_0 : i32, i32
  }
  func.func @transform_6(%arg0: i32) -> (i32, i32) {
    %c0_i32 = arith.constant 0 : i32
    %c0_i32_0 = arith.constant 0 : i32
    %c0_i32_1 = arith.constant 0 : i32
    return %c0_i32, %c0_i32_0 : i32, i32
  }
  func.func @transform_7(%arg0: i32) -> (i32, i32) {
    %c0_i32 = arith.constant 0 : i32
    %c0_i32_0 = arith.constant 0 : i32
    return %arg0, %c0_i32 : i32, i32
  }
}

module attributes {stable_mosaic.version = 11 : i64} {
  func.func @_ffn_kernel(%arg0: i32, %arg1: memref<16x32xbf16, #tpu.memory_space<vmem>>, %arg2: memref<32x64xbf16, #tpu.memory_space<vmem>>, %arg3: memref<1x64xf32, #tpu.memory_space<vmem>>, %arg4: memref<64x32xbf16, #tpu.memory_space<vmem>>, %arg5: memref<1x32xf32, #tpu.memory_space<vmem>>, %arg6: memref<1x32xf32, #tpu.memory_space<vmem>>, %arg7: memref<1x32xf32, #tpu.memory_space<vmem>>, %arg8: memref<16x32xbf16, #tpu.memory_space<vmem>>) attributes {dimension_semantics = [#tpu.dimension_semantics<parallel>], iteration_bounds = array<i64: 1>, scalar_prefetch = 0 : i64, scratch_operands = 0 : i64, tpu.core_type = #tpu.core_type<tc>, window_params = [{transform_indices = @transform_0, window_bounds = array<i64: 16, 32>}, {pipeline_mode = #tpu.pipeline_mode<synchronous>, transform_indices = @transform_1, window_bounds = array<i64: 32, 64>}, {pipeline_mode = #tpu.pipeline_mode<synchronous>, transform_indices = @transform_2, window_bounds = array<i64: 1, 64>}, {pipeline_mode = #tpu.pipeline_mode<synchronous>, transform_indices = @transform_3, window_bounds = array<i64: 64, 32>}, {pipeline_mode = #tpu.pipeline_mode<synchronous>, transform_indices = @transform_4, window_bounds = array<i64: 1, 32>}, {pipeline_mode = #tpu.pipeline_mode<synchronous>, transform_indices = @transform_5, window_bounds = array<i64: 1, 32>}, {pipeline_mode = #tpu.pipeline_mode<synchronous>, transform_indices = @transform_6, window_bounds = array<i64: 1, 32>}, {transform_indices = @transform_7, window_bounds = array<i64: 16, 32>}]} {
    %c0 = arith.constant 0 : index
    %c0_0 = arith.constant 0 : index
    %0 = vector.load %arg1[%c0, %c0_0] : memref<16x32xbf16, #tpu.memory_space<vmem>>, vector<16x32xbf16>
    %c0_1 = arith.constant 0 : index
    %c0_2 = arith.constant 0 : index
    %1 = vector.load %arg2[%c0_1, %c0_2] : memref<32x64xbf16, #tpu.memory_space<vmem>>, vector<32x64xbf16>
    %cst = arith.constant dense<0.000000e+00> : vector<16x64xf32>
    %2 = tpu.matmul %0, %1, %cst {dimension_numbers = #tpu.dot_dimension_numbers<[1], [0], [0], [1], [0, 0, 1, 1], [], []>} : vector<16x32xbf16>, vector<32x64xbf16>, vector<16x64xf32> -> vector<16x64xf32>
    %c0_3 = arith.constant 0 : index
    %c0_4 = arith.constant 0 : index
    %3 = vector.load %arg3[%c0_3, %c0_4] : memref<1x64xf32, #tpu.memory_space<vmem>>, vector<1x64xf32>
    %4 = vector.broadcast %3 : vector<1x64xf32> to vector<16x64xf32>
    %5 = arith.addf %2, %4 : vector<16x64xf32>
    %cst_5 = arith.constant 0.000000e+00 : f32
    %6 = vector.broadcast %cst_5 : f32 to vector<16x64xf32>
    %7 = arith.maximumf %5, %6 : vector<16x64xf32>
    %8 = arith.truncf %7 : vector<16x64xf32> to vector<16x64xbf16>
    %c0_6 = arith.constant 0 : index
    %c0_7 = arith.constant 0 : index
    %9 = vector.load %arg4[%c0_6, %c0_7] : memref<64x32xbf16, #tpu.memory_space<vmem>>, vector<64x32xbf16>
    %cst_8 = arith.constant dense<0.000000e+00> : vector<16x32xf32>
    %10 = tpu.matmul %8, %9, %cst_8 {dimension_numbers = #tpu.dot_dimension_numbers<[1], [0], [0], [1], [0, 0, 1, 1], [], []>} : vector<16x64xbf16>, vector<64x32xbf16>, vector<16x32xf32> -> vector<16x32xf32>
    %c0_9 = arith.constant 0 : index
    %c0_10 = arith.constant 0 : index
    %11 = vector.load %arg5[%c0_9, %c0_10] : memref<1x32xf32, #tpu.memory_space<vmem>>, vector<1x32xf32>
    %12 = vector.broadcast %11 : vector<1x32xf32> to vector<16x32xf32>
    %13 = arith.addf %10, %12 : vector<16x32xf32>
    %14 = arith.extf %0 : vector<16x32xbf16> to vector<16x32xf32>
    %15 = arith.addf %13, %14 : vector<16x32xf32>
    %c0_11 = arith.constant 0 : index
    %c0_12 = arith.constant 0 : index
    %16 = vector.load %arg6[%c0_11, %c0_12] : memref<1x32xf32, #tpu.memory_space<vmem>>, vector<1x32xf32>
    %c0_13 = arith.constant 0 : index
    %c0_14 = arith.constant 0 : index
    %17 = vector.load %arg7[%c0_13, %c0_14] : memref<1x32xf32, #tpu.memory_space<vmem>>, vector<1x32xf32>
    %cst_15 = arith.constant dense<0.000000e+00> : vector<16xf32>
    %18 = vector.multi_reduction <add>, %15, %cst_15 [1] : vector<16x32xf32> to vector<16xf32>
    %19 = vector.shape_cast %18 : vector<16xf32> to vector<16x1xf32>
    %cst_16 = arith.constant 3.200000e+01 : f32
    %20 = vector.broadcast %cst_16 : f32 to vector<16x1xf32>
    %21 = arith.divf %19, %20 : vector<16x1xf32>
    %22 = vector.broadcast %21 : vector<16x1xf32> to vector<16x32xf32>
    %23 = arith.subf %15, %22 : vector<16x32xf32>
    %24 = arith.mulf %23, %23 : vector<16x32xf32>
    %cst_17 = arith.constant dense<0.000000e+00> : vector<16xf32>
    %25 = vector.multi_reduction <add>, %24, %cst_17 [1] : vector<16x32xf32> to vector<16xf32>
    %26 = vector.shape_cast %25 : vector<16xf32> to vector<16x1xf32>
    %cst_18 = arith.constant 3.200000e+01 : f32
    %27 = vector.broadcast %cst_18 : f32 to vector<16x1xf32>
    %28 = arith.divf %26, %27 : vector<16x1xf32>
    %cst_19 = arith.constant 9.99999974E-6 : f32
    %29 = vector.broadcast %cst_19 : f32 to vector<16x1xf32>
    %30 = arith.addf %28, %29 : vector<16x1xf32>
    %31 = math.rsqrt %30 : vector<16x1xf32>
    %32 = vector.broadcast %31 : vector<16x1xf32> to vector<16x32xf32>
    %33 = arith.mulf %23, %32 : vector<16x32xf32>
    %34 = vector.broadcast %16 : vector<1x32xf32> to vector<16x32xf32>
    %35 = arith.mulf %33, %34 : vector<16x32xf32>
    %36 = vector.broadcast %17 : vector<1x32xf32> to vector<16x32xf32>
    %37 = arith.addf %35, %36 : vector<16x32xf32>
    %38 = arith.truncf %37 : vector<16x32xf32> to vector<16x32xbf16>
    %c0_20 = arith.constant 0 : index
    %c0_21 = arith.constant 0 : index
    %39 = vector.load %arg8[%c0_20, %c0_21] : memref<16x32xbf16, #tpu.memory_space<vmem>>, vector<16x32xbf16>
    tpu.vector_store %arg8[%c0_20, %c0_21], %38 {strides = array<i32>} : memref<16x32xbf16, #tpu.memory_space<vmem>>, vector<16x32xbf16>,
    return
  }
  func.func @transform_0(%arg0: i32) -> (i32, i32) {
    %c0_i32 = arith.constant 0 : i32
    %c0_i32_0 = arith.constant 0 : i32
    return %arg0, %c0_i32 : i32, i32
  }
  func.func @transform_1(%arg0: i32) -> (i32, i32) {
    %c0_i32 = arith.constant 0 : i32
    %c0_i32_0 = arith.constant 0 : i32
    %c0_i32_1 = arith.constant 0 : i32
    return %c0_i32, %c0_i32_0 : i32, i32
  }
  func.func @transform_2(%arg0: i32) -> (i32, i32) {
    %c0_i32 = arith.constant 0 : i32
    %c0_i32_0 = arith.constant 0 : i32
    %c0_i32_1 = arith.constant 0 : i32
    return %c0_i32, %c0_i32_0 : i32, i32
  }
  func.func @transform_3(%arg0: i32) -> (i32, i32) {
    %c0_i32 = arith.constant 0 : i32
    %c0_i32_0 = arith.constant 0 : i32
    %c0_i32_1 = arith.constant 0 : i32
    return %c0_i32, %c0_i32_0 : i32, i32
  }
  func.func @transform_4(%arg0: i32) -> (i32, i32) {
    %c0_i32 = arith.constant 0 : i32
    %c0_i32_0 = arith.constant 0 : i32
    %c0_i32_1 = arith.constant 0 : i32
    return %c0_i32, %c0_i32_0 : i32, i32
  }
  func.func @transform_5(%arg0: i32) -> (i32, i32) {
    %c0_i32 = arith.constant 0 : i32
    %c0_i32_0 = arith.constant 0 : i32
    %c0_i32_1 = arith.constant 0 : i32
    return %c0_i32, %c0_i32_0 : i32, i32
  }
  func.func @transform_6(%arg0: i32) -> (i32, i32) {
    %c0_i32 = arith.constant 0 : i32
    %c0_i32_0 = arith.constant 0 : i32
    %c0_i32_1 = arith.constant 0 : i32
    return %c0_i32, %c0_i32_0 : i32, i32
  }
  func.func @transform_7(%arg0: i32) -> (i32, i32) {
    %c0_i32 = arith.constant 0 : i32
    %c0_i32_0 = arith.constant 0 : i32
    return %arg0, %c0_i32 : i32, i32
  }
}

module attributes {stable_mosaic.version = 11 : i64} {
  func.func @_linear_ln_kernel(%arg0: i32, %arg1: memref<16x32xbf16, #tpu.memory_space<vmem>>, %arg2: memref<32x32xbf16, #tpu.memory_space<vmem>>, %arg3: memref<1x32xf32, #tpu.memory_space<vmem>>, %arg4: memref<1x32xf32, #tpu.memory_space<vmem>>, %arg5: memref<1x32xf32, #tpu.memory_space<vmem>>, %arg6: memref<16x32xbf16, #tpu.memory_space<vmem>>) attributes {dimension_semantics = [#tpu.dimension_semantics<parallel>], iteration_bounds = array<i64: 1>, scalar_prefetch = 0 : i64, scratch_operands = 0 : i64, tpu.core_type = #tpu.core_type<tc>, window_params = [{transform_indices = @transform_0, window_bounds = array<i64: 16, 32>}, {pipeline_mode = #tpu.pipeline_mode<synchronous>, transform_indices = @transform_1, window_bounds = array<i64: 32, 32>}, {pipeline_mode = #tpu.pipeline_mode<synchronous>, transform_indices = @transform_2, window_bounds = array<i64: 1, 32>}, {pipeline_mode = #tpu.pipeline_mode<synchronous>, transform_indices = @transform_3, window_bounds = array<i64: 1, 32>}, {pipeline_mode = #tpu.pipeline_mode<synchronous>, transform_indices = @transform_4, window_bounds = array<i64: 1, 32>}, {transform_indices = @transform_5, window_bounds = array<i64: 16, 32>}]} {
    %c0 = arith.constant 0 : index
    %c0_0 = arith.constant 0 : index
    %0 = vector.load %arg1[%c0, %c0_0] : memref<16x32xbf16, #tpu.memory_space<vmem>>, vector<16x32xbf16>
    %c0_1 = arith.constant 0 : index
    %c0_2 = arith.constant 0 : index
    %1 = vector.load %arg2[%c0_1, %c0_2] : memref<32x32xbf16, #tpu.memory_space<vmem>>, vector<32x32xbf16>
    %cst = arith.constant dense<0.000000e+00> : vector<16x32xf32>
    %2 = tpu.matmul %0, %1, %cst {dimension_numbers = #tpu.dot_dimension_numbers<[1], [0], [0], [1], [0, 0, 1, 1], [], []>} : vector<16x32xbf16>, vector<32x32xbf16>, vector<16x32xf32> -> vector<16x32xf32>
    %c0_3 = arith.constant 0 : index
    %c0_4 = arith.constant 0 : index
    %3 = vector.load %arg3[%c0_3, %c0_4] : memref<1x32xf32, #tpu.memory_space<vmem>>, vector<1x32xf32>
    %4 = vector.broadcast %3 : vector<1x32xf32> to vector<16x32xf32>
    %5 = arith.addf %2, %4 : vector<16x32xf32>
    %c0_5 = arith.constant 0 : index
    %c0_6 = arith.constant 0 : index
    %6 = vector.load %arg4[%c0_5, %c0_6] : memref<1x32xf32, #tpu.memory_space<vmem>>, vector<1x32xf32>
    %c0_7 = arith.constant 0 : index
    %c0_8 = arith.constant 0 : index
    %7 = vector.load %arg5[%c0_7, %c0_8] : memref<1x32xf32, #tpu.memory_space<vmem>>, vector<1x32xf32>
    %cst_9 = arith.constant dense<0.000000e+00> : vector<16xf32>
    %8 = vector.multi_reduction <add>, %5, %cst_9 [1] : vector<16x32xf32> to vector<16xf32>
    %9 = vector.shape_cast %8 : vector<16xf32> to vector<16x1xf32>
    %cst_10 = arith.constant 3.200000e+01 : f32
    %10 = vector.broadcast %cst_10 : f32 to vector<16x1xf32>
    %11 = arith.divf %9, %10 : vector<16x1xf32>
    %12 = vector.broadcast %11 : vector<16x1xf32> to vector<16x32xf32>
    %13 = arith.subf %5, %12 : vector<16x32xf32>
    %14 = arith.mulf %13, %13 : vector<16x32xf32>
    %cst_11 = arith.constant dense<0.000000e+00> : vector<16xf32>
    %15 = vector.multi_reduction <add>, %14, %cst_11 [1] : vector<16x32xf32> to vector<16xf32>
    %16 = vector.shape_cast %15 : vector<16xf32> to vector<16x1xf32>
    %cst_12 = arith.constant 3.200000e+01 : f32
    %17 = vector.broadcast %cst_12 : f32 to vector<16x1xf32>
    %18 = arith.divf %16, %17 : vector<16x1xf32>
    %cst_13 = arith.constant 9.99999974E-6 : f32
    %19 = vector.broadcast %cst_13 : f32 to vector<16x1xf32>
    %20 = arith.addf %18, %19 : vector<16x1xf32>
    %21 = math.rsqrt %20 : vector<16x1xf32>
    %22 = vector.broadcast %21 : vector<16x1xf32> to vector<16x32xf32>
    %23 = arith.mulf %13, %22 : vector<16x32xf32>
    %24 = vector.broadcast %6 : vector<1x32xf32> to vector<16x32xf32>
    %25 = arith.mulf %23, %24 : vector<16x32xf32>
    %26 = vector.broadcast %7 : vector<1x32xf32> to vector<16x32xf32>
    %27 = arith.addf %25, %26 : vector<16x32xf32>
    %cst_14 = arith.constant 5.000000e-01 : f32
    %28 = vector.broadcast %cst_14 : f32 to vector<16x32xf32>
    %29 = arith.mulf %28, %27 : vector<16x32xf32>
    %cst_15 = arith.constant 4.471500e-02 : f32
    %30 = vector.broadcast %cst_15 : f32 to vector<16x32xf32>
    %31 = arith.mulf %30, %27 : vector<16x32xf32>
    %32 = arith.mulf %31, %27 : vector<16x32xf32>
    %33 = arith.mulf %32, %27 : vector<16x32xf32>
    %34 = arith.addf %27, %33 : vector<16x32xf32>
    %cst_16 = arith.constant 0.797884583 : f32
    %35 = vector.broadcast %cst_16 : f32 to vector<16x32xf32>
    %36 = arith.mulf %35, %34 : vector<16x32xf32>
    %37 = math.tanh %36 : vector<16x32xf32>
    %cst_17 = arith.constant 1.000000e+00 : f32
    %38 = vector.broadcast %cst_17 : f32 to vector<16x32xf32>
    %39 = arith.addf %38, %37 : vector<16x32xf32>
    %40 = arith.mulf %29, %39 : vector<16x32xf32>
    %41 = arith.truncf %40 : vector<16x32xf32> to vector<16x32xbf16>
    %c0_18 = arith.constant 0 : index
    %c0_19 = arith.constant 0 : index
    %42 = vector.load %arg6[%c0_18, %c0_19] : memref<16x32xbf16, #tpu.memory_space<vmem>>, vector<16x32xbf16>
    tpu.vector_store %arg6[%c0_18, %c0_19], %41 {strides = array<i32>} : memref<16x32xbf16, #tpu.memory_space<vmem>>, vector<16x32xbf16>,
    return
  }
  func.func @transform_0(%arg0: i32) -> (i32, i32) {
    %c0_i32 = arith.constant 0 : i32
    %c0_i32_0 = arith.constant 0 : i32
    return %arg0, %c0_i32 : i32, i32
  }
  func.func @transform_1(%arg0: i32) -> (i32, i32) {
    %c0_i32 = arith.constant 0 : i32
    %c0_i32_0 = arith.constant 0 : i32
    %c0_i32_1 = arith.constant 0 : i32
    return %c0_i32, %c0_i32_0 : i32, i32
  }
  func.func @transform_2(%arg0: i32) -> (i32, i32) {
    %c0_i32 = arith.constant 0 : i32
    %c0_i32_0 = arith.constant 0 : i32
    %c0_i32_1 = arith.constant 0 : i32
    return %c0_i32, %c0_i32_0 : i32, i32
  }
  func.func @transform_3(%arg0: i32) -> (i32, i32) {
    %c0_i32 = arith.constant 0 : i32
    %c0_i32_0 = arith.constant 0 : i32
    %c0_i32_1 = arith.constant 0 : i32
    return %c0_i32, %c0_i32_0 : i32, i32
  }
  func.func @transform_4(%arg0: i32) -> (i32, i32) {
    %c0_i32 = arith.constant 0 : i32
    %c0_i32_0 = arith.constant 0 : i32
    %c0_i32_1 = arith.constant 0 : i32
    return %c0_i32, %c0_i32_0 : i32, i32
  }
  func.func @transform_5(%arg0: i32) -> (i32, i32) {
    %c0_i32 = arith.constant 0 : i32
    %c0_i32_0 = arith.constant 0 : i32
    return %arg0, %c0_i32 : i32, i32
  }
}

module attributes {stable_mosaic.version = 11 : i64} {
  func.func @_rb_tail_kernel(%arg0: i32, %arg1: memref<16x32xbf16, #tpu.memory_space<vmem>>, %arg2: memref<32x32xbf16, #tpu.memory_space<vmem>>, %arg3: memref<1x32xf32, #tpu.memory_space<vmem>>, %arg4: memref<16x32xbf16, #tpu.memory_space<vmem>>, %arg5: memref<1x32xf32, #tpu.memory_space<vmem>>, %arg6: memref<1x32xf32, #tpu.memory_space<vmem>>, %arg7: memref<1x32xf32, #tpu.memory_space<vmem>>, %arg8: memref<1x32xf32, #tpu.memory_space<vmem>>, %arg9: memref<16x32xbf16, #tpu.memory_space<vmem>>) attributes {dimension_semantics = [#tpu.dimension_semantics<parallel>], iteration_bounds = array<i64: 1>, scalar_prefetch = 0 : i64, scratch_operands = 0 : i64, tpu.core_type = #tpu.core_type<tc>, window_params = [{transform_indices = @transform_0, window_bounds = array<i64: 16, 32>}, {pipeline_mode = #tpu.pipeline_mode<synchronous>, transform_indices = @transform_1, window_bounds = array<i64: 32, 32>}, {pipeline_mode = #tpu.pipeline_mode<synchronous>, transform_indices = @transform_2, window_bounds = array<i64: 1, 32>}, {transform_indices = @transform_3, window_bounds = array<i64: 16, 32>}, {pipeline_mode = #tpu.pipeline_mode<synchronous>, transform_indices = @transform_4, window_bounds = array<i64: 1, 32>}, {pipeline_mode = #tpu.pipeline_mode<synchronous>, transform_indices = @transform_5, window_bounds = array<i64: 1, 32>}, {pipeline_mode = #tpu.pipeline_mode<synchronous>, transform_indices = @transform_6, window_bounds = array<i64: 1, 32>}, {pipeline_mode = #tpu.pipeline_mode<synchronous>, transform_indices = @transform_7, window_bounds = array<i64: 1, 32>}, {transform_indices = @transform_8, window_bounds = array<i64: 16, 32>}]} {
    %c0 = arith.constant 0 : index
    %c0_0 = arith.constant 0 : index
    %0 = vector.load %arg1[%c0, %c0_0] : memref<16x32xbf16, #tpu.memory_space<vmem>>, vector<16x32xbf16>
    %c0_1 = arith.constant 0 : index
    %c0_2 = arith.constant 0 : index
    %1 = vector.load %arg2[%c0_1, %c0_2] : memref<32x32xbf16, #tpu.memory_space<vmem>>, vector<32x32xbf16>
    %cst = arith.constant dense<0.000000e+00> : vector<16x32xf32>
    %2 = tpu.matmul %0, %1, %cst {dimension_numbers = #tpu.dot_dimension_numbers<[1], [0], [0], [1], [0, 0, 1, 1], [], []>} : vector<16x32xbf16>, vector<32x32xbf16>, vector<16x32xf32> -> vector<16x32xf32>
    %c0_3 = arith.constant 0 : index
    %c0_4 = arith.constant 0 : index
    %3 = vector.load %arg3[%c0_3, %c0_4] : memref<1x32xf32, #tpu.memory_space<vmem>>, vector<1x32xf32>
    %4 = vector.broadcast %3 : vector<1x32xf32> to vector<16x32xf32>
    %5 = arith.addf %2, %4 : vector<16x32xf32>
    %c0_5 = arith.constant 0 : index
    %c0_6 = arith.constant 0 : index
    %6 = vector.load %arg5[%c0_5, %c0_6] : memref<1x32xf32, #tpu.memory_space<vmem>>, vector<1x32xf32>
    %c0_7 = arith.constant 0 : index
    %c0_8 = arith.constant 0 : index
    %7 = vector.load %arg6[%c0_7, %c0_8] : memref<1x32xf32, #tpu.memory_space<vmem>>, vector<1x32xf32>
    %cst_9 = arith.constant dense<0.000000e+00> : vector<16xf32>
    %8 = vector.multi_reduction <add>, %5, %cst_9 [1] : vector<16x32xf32> to vector<16xf32>
    %9 = vector.shape_cast %8 : vector<16xf32> to vector<16x1xf32>
    %cst_10 = arith.constant 3.200000e+01 : f32
    %10 = vector.broadcast %cst_10 : f32 to vector<16x1xf32>
    %11 = arith.divf %9, %10 : vector<16x1xf32>
    %12 = vector.broadcast %11 : vector<16x1xf32> to vector<16x32xf32>
    %13 = arith.subf %5, %12 : vector<16x32xf32>
    %14 = arith.mulf %13, %13 : vector<16x32xf32>
    %cst_11 = arith.constant dense<0.000000e+00> : vector<16xf32>
    %15 = vector.multi_reduction <add>, %14, %cst_11 [1] : vector<16x32xf32> to vector<16xf32>
    %16 = vector.shape_cast %15 : vector<16xf32> to vector<16x1xf32>
    %cst_12 = arith.constant 3.200000e+01 : f32
    %17 = vector.broadcast %cst_12 : f32 to vector<16x1xf32>
    %18 = arith.divf %16, %17 : vector<16x1xf32>
    %cst_13 = arith.constant 9.99999974E-6 : f32
    %19 = vector.broadcast %cst_13 : f32 to vector<16x1xf32>
    %20 = arith.addf %18, %19 : vector<16x1xf32>
    %21 = math.rsqrt %20 : vector<16x1xf32>
    %22 = vector.broadcast %21 : vector<16x1xf32> to vector<16x32xf32>
    %23 = arith.mulf %13, %22 : vector<16x32xf32>
    %24 = vector.broadcast %6 : vector<1x32xf32> to vector<16x32xf32>
    %25 = arith.mulf %23, %24 : vector<16x32xf32>
    %26 = vector.broadcast %7 : vector<1x32xf32> to vector<16x32xf32>
    %27 = arith.addf %25, %26 : vector<16x32xf32>
    %c0_14 = arith.constant 0 : index
    %c0_15 = arith.constant 0 : index
    %28 = vector.load %arg4[%c0_14, %c0_15] : memref<16x32xbf16, #tpu.memory_space<vmem>>, vector<16x32xbf16>
    %29 = arith.extf %28 : vector<16x32xbf16> to vector<16x32xf32>
    %30 = arith.addf %27, %29 : vector<16x32xf32>
    %c0_16 = arith.constant 0 : index
    %c0_17 = arith.constant 0 : index
    %31 = vector.load %arg7[%c0_16, %c0_17] : memref<1x32xf32, #tpu.memory_space<vmem>>, vector<1x32xf32>
    %c0_18 = arith.constant 0 : index
    %c0_19 = arith.constant 0 : index
    %32 = vector.load %arg8[%c0_18, %c0_19] : memref<1x32xf32, #tpu.memory_space<vmem>>, vector<1x32xf32>
    %cst_20 = arith.constant dense<0.000000e+00> : vector<16xf32>
    %33 = vector.multi_reduction <add>, %30, %cst_20 [1] : vector<16x32xf32> to vector<16xf32>
    %34 = vector.shape_cast %33 : vector<16xf32> to vector<16x1xf32>
    %cst_21 = arith.constant 3.200000e+01 : f32
    %35 = vector.broadcast %cst_21 : f32 to vector<16x1xf32>
    %36 = arith.divf %34, %35 : vector<16x1xf32>
    %37 = vector.broadcast %36 : vector<16x1xf32> to vector<16x32xf32>
    %38 = arith.subf %30, %37 : vector<16x32xf32>
    %39 = arith.mulf %38, %38 : vector<16x32xf32>
    %cst_22 = arith.constant dense<0.000000e+00> : vector<16xf32>
    %40 = vector.multi_reduction <add>, %39, %cst_22 [1] : vector<16x32xf32> to vector<16xf32>
    %41 = vector.shape_cast %40 : vector<16xf32> to vector<16x1xf32>
    %cst_23 = arith.constant 3.200000e+01 : f32
    %42 = vector.broadcast %cst_23 : f32 to vector<16x1xf32>
    %43 = arith.divf %41, %42 : vector<16x1xf32>
    %cst_24 = arith.constant 9.99999974E-6 : f32
    %44 = vector.broadcast %cst_24 : f32 to vector<16x1xf32>
    %45 = arith.addf %43, %44 : vector<16x1xf32>
    %46 = math.rsqrt %45 : vector<16x1xf32>
    %47 = vector.broadcast %46 : vector<16x1xf32> to vector<16x32xf32>
    %48 = arith.mulf %38, %47 : vector<16x32xf32>
    %49 = vector.broadcast %31 : vector<1x32xf32> to vector<16x32xf32>
    %50 = arith.mulf %48, %49 : vector<16x32xf32>
    %51 = vector.broadcast %32 : vector<1x32xf32> to vector<16x32xf32>
    %52 = arith.addf %50, %51 : vector<16x32xf32>
    %cst_25 = arith.constant 5.000000e-01 : f32
    %53 = vector.broadcast %cst_25 : f32 to vector<16x32xf32>
    %54 = arith.mulf %53, %52 : vector<16x32xf32>
    %cst_26 = arith.constant 4.471500e-02 : f32
    %55 = vector.broadcast %cst_26 : f32 to vector<16x32xf32>
    %56 = arith.mulf %55, %52 : vector<16x32xf32>
    %57 = arith.mulf %56, %52 : vector<16x32xf32>
    %58 = arith.mulf %57, %52 : vector<16x32xf32>
    %59 = arith.addf %52, %58 : vector<16x32xf32>
    %cst_27 = arith.constant 0.797884583 : f32
    %60 = vector.broadcast %cst_27 : f32 to vector<16x32xf32>
    %61 = arith.mulf %60, %59 : vector<16x32xf32>
    %62 = math.tanh %61 : vector<16x32xf32>
    %cst_28 = arith.constant 1.000000e+00 : f32
    %63 = vector.broadcast %cst_28 : f32 to vector<16x32xf32>
    %64 = arith.addf %63, %62 : vector<16x32xf32>
    %65 = arith.mulf %54, %64 : vector<16x32xf32>
    %66 = arith.truncf %65 : vector<16x32xf32> to vector<16x32xbf16>
    %c0_29 = arith.constant 0 : index
    %c0_30 = arith.constant 0 : index
    %67 = vector.load %arg9[%c0_29, %c0_30] : memref<16x32xbf16, #tpu.memory_space<vmem>>, vector<16x32xbf16>
    tpu.vector_store %arg9[%c0_29, %c0_30], %66 {strides = array<i32>} : memref<16x32xbf16, #tpu.memory_space<vmem>>, vector<16x32xbf16>,
    return
  }
  func.func @transform_0(%arg0: i32) -> (i32, i32) {
    %c0_i32 = arith.constant 0 : i32
    %c0_i32_0 = arith.constant 0 : i32
    return %arg0, %c0_i32 : i32, i32
  }
  func.func @transform_1(%arg0: i32) -> (i32, i32) {
    %c0_i32 = arith.constant 0 : i32
    %c0_i32_0 = arith.constant 0 : i32
    %c0_i32_1 = arith.constant 0 : i32
    return %c0_i32, %c0_i32_0 : i32, i32
  }
  func.func @transform_2(%arg0: i32) -> (i32, i32) {
    %c0_i32 = arith.constant 0 : i32
    %c0_i32_0 = arith.constant 0 : i32
    %c0_i32_1 = arith.constant 0 : i32
    return %c0_i32, %c0_i32_0 : i32, i32
  }
  func.func @transform_3(%arg0: i32) -> (i32, i32) {
    %c0_i32 = arith.constant 0 : i32
    %c0_i32_0 = arith.constant 0 : i32
    return %arg0, %c0_i32 : i32, i32
  }
  func.func @transform_4(%arg0: i32) -> (i32, i32) {
    %c0_i32 = arith.constant 0 : i32
    %c0_i32_0 = arith.constant 0 : i32
    %c0_i32_1 = arith.constant 0 : i32
    return %c0_i32, %c0_i32_0 : i32, i32
  }
  func.func @transform_5(%arg0: i32) -> (i32, i32) {
    %c0_i32 = arith.constant 0 : i32
    %c0_i32_0 = arith.constant 0 : i32
    %c0_i32_1 = arith.constant 0 : i32
    return %c0_i32, %c0_i32_0 : i32, i32
  }
  func.func @transform_6(%arg0: i32) -> (i32, i32) {
    %c0_i32 = arith.constant 0 : i32
    %c0_i32_0 = arith.constant 0 : i32
    %c0_i32_1 = arith.constant 0 : i32
    return %c0_i32, %c0_i32_0 : i32, i32
  }
  func.func @transform_7(%arg0: i32) -> (i32, i32) {
    %c0_i32 = arith.constant 0 : i32
    %c0_i32_0 = arith.constant 0 : i32
    %c0_i32_1 = arith.constant 0 : i32
    return %c0_i32, %c0_i32_0 : i32, i32
  }
  func.func @transform_8(%arg0: i32) -> (i32, i32) {
    %c0_i32 = arith.constant 0 : i32
    %c0_i32_0 = arith.constant 0 : i32
    return %arg0, %c0_i32 : i32, i32
  }
}

</mosaic_0001>

<bundles_post_ra>
// kernel: _lambda_.9
= control target key start
LH: loop header
LB: loop body
LE: loop exit
PB: predicated region body
PF: predicated region fallthrough
CT: control target
= control target key end

     0   :  { %s338_s15 = smov 0   ;;  %s364_s0 = inlined_call_operand.vmem [shape: bf16[16,32], index: 0, kind: input, shape index: {}]   ;;  %s365_s1 = inlined_call_operand.vmem [shape: f32[64,32], index: 1, kind: input, shape index: {}]   ;;  %s366_s2 = inlined_call_operand.vmem [shape: f32[1,32], index: 2, kind: input, shape index: {}]   ;;  %s367_s3 = inlined_call_operand.vmem [shape: f32[1,32], index: 3, kind: input, shape index: {}]   ;;  %s368_s4 = inlined_call_operand.vmem [shape: bf16[16,32], index: 4, kind: output, shape index: {}]  }
   0x1 LB: > { %s284_s16 = sadd.s32 4294967295, %s311_s15   ;;  %p288_p0 = scmp.ge.s32.totalorder %s311_s15, 1  ;;  %s311_s15 = sphi %s338_s15, %s14_s15  }
   0x2   : > { %p161_p1 = scmp.lt.s32.totalorder %s311_s15, 3 }
   0x4   : > { %p162_p2 = pnand %p288_p0, %p161_p1 }
   0x5   : > { %p185_p3 = scmp.lt.s32.totalorder (!%p162_p2), %s284_s16, 1 }
   0x6   : > { %165 = sbr.rel (%p162_p2) target bundleno = 330 (0x14a), region = 36 }
   0xb   : > { %s370_s16 = smov (!%p185_p3, %s284_s16), 1  ;;  %v195_v1 = vld [vmem:[%s365_s1] sm:$0xff]  ;;  %vm199_vm0 = vcmask 261120   ;;  %vm229_vm1 = vcmask 257024  }
   0xc   : > { %s289_s17 = sshll.u32 %s370_s16, 2  ;;  %v291_v14 = vld [vmem:[%s366_s2] ss:$0 sm:$0xff] }
   0xd   : > { %s188_s20 = scalar_lea.vmem %s364_s0, %s289_s17  ;;  %v292_v16 = vld [vmem:[%s367_s3] ss:$0 sm:$0xff]  ;;  %s192_s29 = scalar_lea.vmem %s368_s4, %s289_s17 }
   0xe   : > { %v193_v0 = vld [vmem:[%s188_s20] sm:$0xf] }
   0xf   : > { %v194_v2 = vunpack.c.l.bf16 %v193_v0 }
  0x11   : > { %v196_v3 = vadd.f32 %v195_v1, %v194_v2 }
  0x13   : > { %v200_v4 = vsel %vm199_vm0, %v196_v3, 0.0 }
  0x14   : > { %201 = vadd.xlane.f32.xlu0 %v200_v4 }
  0x9d   : > { %v202_v5 = vpop.xlane.xlu0 %201 }
  0x9e   : > { %v204_v6 = vmul.f32 0.03125, %v202_v5 }
  0xa0   : > { %v205_v7 = vsub.f32 %v196_v3, %v204_v6 }
  0xa2   : > { %v206_v8 = vmul.f32 %v205_v7, %v205_v7 }
  0xa4   : > { %v207_v9 = vsel %vm199_vm0, %v206_v8, 0.0 }
  0xa5   : > { %208 = vadd.xlane.f32.xlu0 %v207_v9 }
 0x12e   : > { %v209_v10 = vpop.xlane.xlu0 %208 }
 0x12f   : > { %v210_v11 = vmul.f32 0.03125, %v209_v10 }
 0x131   : > { %v211_v12 = vadd.f32 1e-05, %v210_v11 }
 0x133   : > { %303 = vrsqrt.f32 %v211_v12 }
 0x140   : > { %v304_v13 = vpop.eup %303 }
 0x141   : > { %v213_v15 = vmul.f32 %v304_v13, %v205_v7 }
 0x143   : > { %v220_v17 = vmul.f32 %v291_v14, %v213_v15 }
 0x145   : > { %v227_v18 = vadd.f32 %v292_v16, %v220_v17 }
 0x147   : > { %v228_v19 = vpack.c.bf16 %v227_v18, %v227_v18 }
 0x149   : > { %230 = vst.msk [vmem:[%s192_s29] sm:$0xf] %vm229_vm1, %v228_v19 }
 0x14a PF: > { %s14_s15 = sadd.s32 1, %s311_s15  }
 0x14b   : > { %p11_p4 = scmp.ge.s32.totalorder %s14_s15, 4  }
 0x14d   :  { %13 = sbr.rel (!%p11_p4) target bundleno = 1 (0x1), region = 66 }

// kernel: _lambda_.11
= control target key start
LH: loop header
LB: loop body
LE: loop exit
PB: predicated region body
PF: predicated region fallthrough
CT: control target
= control target key end

     0   :  { %v312_v0 = vmov 0.0   ;;  %vm313_vm0 = vmmov 0   ;;  %vm57_vm1 = vcmask 261120   ;;  %vm144_vm2 = vcmask 523264   ;;  %s398_s1 = inlined_call_operand.vmem [shape: bf16[32,64], index: 1, kind: input, shape index: {}]   ;;  %s399_s0 = inlined_call_operand.vmem [shape: bf16[16,32], index: 0, kind: input, shape index: {}]   ;;  %s400_s3 = inlined_call_operand.vmem [shape: bf16[64,32], index: 3, kind: input, shape index: {}]   ;;  %s401_s2 = inlined_call_operand.vmem [shape: f32[1,64], index: 2, kind: input, shape index: {}]   ;;  %s402_s4 = inlined_call_operand.vmem [shape: f32[1,32], index: 4, kind: input, shape index: {}]   ;;  %s403_s5 = inlined_call_operand.vmem [shape: f32[1,32], index: 5, kind: input, shape index: {}]   ;;  %s404_s6 = inlined_call_operand.vmem [shape: f32[1,32], index: 6, kind: input, shape index: {}]   ;;  %s405_s7 = inlined_call_operand.vmem [shape: bf16[16,32], index: 7, kind: output, shape index: {}]  }
   0x1   :  { %278 = vmatprep.subr.bf16.mxu0 %v312_v0  ;;  %v300_v1 = vld [vmem:[%s398_s1 + $0x8] sm:$0xff]   ;;  %282 = vmatprep.mubr.msk.bf16.mxu0 %vm313_vm0, %v312_v0  ;;  %v301_v2 = vld [vmem:[%s398_s1] sm:$0xff]   ;;  %v303_v4 = vld [vmem:[%s400_s3 + $0x18] sm:$0xff]   ;;  %vm246_vm3 = vcmask 257024  }
   0x2   :  { %286 = vmatprep.subr.bf16.mxu1 %v312_v0  ;;  %294 = vmatprep.mubr.msk.bf16.mxu1 %vm313_vm0, %v312_v0  ;;  %v27_v3 = vld [vmem:[%s399_s0] sm:$0xff]   ;;  %v304_v5 = vld [vmem:[%s400_s3 + $0x10] sm:$0xff]   ;;  %v305_v6 = vld [vmem:[%s400_s3 + $0x8] sm:$0xff]  }
   0x3   :  { %279 = vmatpush3.bf16.msra.mxu0 %v300_v1  ;;  %287 = vmatpush3.bf16.msra.mxu1 %v303_v4  ;;  %v306_v7 = vld [vmem:[%s400_s3] sm:$0xff]   ;;  %v189_v19 = vunpack.c.l.bf16 %v27_v3  ;;  %v190_v24 = vunpack.c.h.bf16 %v27_v3 }
   0x4   :  { %280 = vmatprep.subr.bf16.mxu0 %v312_v0  ;;  %288 = vmatprep.subr.bf16.mxu1 %v312_v0  ;;  %v253_v8 = vld [vmem:[%s401_s2] ss:$0 sm:$0xff] }
   0x5   :  { %v258_v18 = vld [vmem:[%s402_s4] ss:$0 sm:$0xff] }
   0x6   :  { %v264_v48 = vld [vmem:[%s403_s5] ss:$0 sm:$0xff] }
   0x7   :  { %281 = vmatpush3.bf16.msra.mxu0 %v301_v2  ;;  %289 = vmatpush3.bf16.msra.mxu1 %v304_v5  ;;  %v265_v50 = vld [vmem:[%s404_s6] ss:$0 sm:$0xff] }
   0x8   :  { %290 = vmatprep.subr.bf16.mxu1 %v312_v0 }
   0xa   :  { %283 = vmatmul.mubr.msk.bf16.vlgmr.msra.gmra.mxu0 %vm57_vm1, %v27_v3 }
   0xb   :  { %291 = vmatpush3.bf16.msra.mxu1 %v305_v6 }
   0xc   :  { %292 = vmatprep.subr.bf16.mxu1 %v312_v0 }
   0xf   :  { %293 = vmatpush3.bf16.msra.mxu1 %v306_v7 }
  0xca   :  { %v95_v9 = vpop.f32.mrf.mxu0 }
  0xcb   :  { %v96_v11 = vadd.f32 %v253_v8, %v95_v9 }
  0xcc   :  { %v284_v10 = vpop.f32.mrf.mxu0 }
  0xcd   :  { %v102_v15 = vmax.f32 %v96_v11, 0.0 }
  0xce   :  { %v98_v12 = vpop.f32.mrf.mxu0 }
  0xcf   :  { %v99_v13 = vadd.f32 %v253_v8, %v98_v12 }
  0xd0   :  { %v285_v14 = vpop.f32.mrf.mxu0 }
  0xd1   :  { %v103_v16 = vmax.f32 %v99_v13, 0.0 }
  0xd3   :  { %v104_v17 = vpack.c.bf16 %v103_v16, %v102_v15 }
  0xd5   :  { %295 = vmatmul.mubr.msk.bf16.vlgmr.msra.gmra.mxu1 %vm144_vm2, %v104_v17 }
 0x195   :  { %v182_v20 = vpop.f32.mrf.mxu1 }
 0x196   :  { %v183_v21 = vadd.f32 %v258_v18, %v182_v20 }
 0x197   :  { %v296_v22 = vpop.f32.mrf.mxu1 }
 0x198   :  { %v191_v23 = vadd.f32 %v189_v19, %v183_v21 }
 0x199   :  { %v185_v25 = vpop.f32.mrf.mxu1 }
 0x19a   :  { %v186_v26 = vadd.f32 %v258_v18, %v185_v25  ;;  %v195_v27 = vsel %vm57_vm1, %v191_v23, 0.0 }
 0x19b   :  { %196 = vadd.xlane.f32.xlu0 %v195_v27  ;;  %v297_v28 = vpop.f32.mrf.mxu1 }
 0x19c   :  { %v192_v29 = vadd.f32 %v190_v24, %v186_v26 }
 0x19e   :  { %v198_v30 = vsel %vm57_vm1, %v192_v29, 0.0 }
 0x19f   :  { %199 = vadd.xlane.f32.xlu0 %v198_v30 }
 0x224   :  { %v197_v31 = vpop.xlane.xlu0 %196 }
 0x225   :  { %v202_v32 = vmul.f32 0.03125, %v197_v31 }
 0x227   :  { %v204_v33 = vsub.f32 %v191_v23, %v202_v32 }
 0x228   :  { %v200_v34 = vpop.xlane.xlu0 %199 }
 0x229   :  { %v203_v35 = vmul.f32 0.03125, %v200_v34  ;;  %v206_v36 = vmul.f32 %v204_v33, %v204_v33 }
 0x22b   :  { %v205_v37 = vsub.f32 %v192_v29, %v203_v35  ;;  %v208_v38 = vsel %vm57_vm1, %v206_v36, 0.0 }
 0x22c   :  { %209 = vadd.xlane.f32.xlu1 %v208_v38 }
 0x22d   :  { %v207_v39 = vmul.f32 %v205_v37, %v205_v37 }
 0x22f   :  { %v211_v40 = vsel %vm57_vm1, %v207_v39, 0.0 }
 0x230   :  { %212 = vadd.xlane.f32.xlu1 %v211_v40 }
 0x2b5   :  { %v210_v41 = vpop.xlane.xlu1 %209 }
 0x2b6   :  { %v214_v42 = vmul.f32 0.03125, %v210_v41 }
 0x2b8   :  { %v216_v43 = vadd.f32 1e-05, %v214_v42 }
 0x2b9   :  { %v213_v44 = vpop.xlane.xlu1 %212 }
 0x2ba   :  { %308 = vrsqrt.f32 %v216_v43  ;;  %v215_v45 = vmul.f32 0.03125, %v213_v44 }
 0x2bc   :  { %v217_v46 = vadd.f32 1e-05, %v215_v45 }
 0x2be   :  { %310 = vrsqrt.f32 %v217_v46 }
 0x2c7   :  { %v309_v47 = vpop.eup %308 }
 0x2c8   :  { %v220_v49 = vmul.f32 %v309_v47, %v204_v33 }
 0x2ca   :  { %v228_v51 = vmul.f32 %v264_v48, %v220_v49 }
 0x2cb   :  { %v311_v52 = vpop.eup %310 }
 0x2cc   :  { %v236_v53 = vadd.f32 %v265_v50, %v228_v51  ;;  %v221_v54 = vmul.f32 %v311_v52, %v205_v37 }
 0x2ce   :  { %v268_v55 = vpack.c.bf16 %v236_v53, %v236_v53  ;;  %v229_v56 = vmul.f32 %v264_v48, %v221_v54 }
 0x2d0   :  { %247 = vst.msk [vmem:[%s405_s7] sm:$0xf] %vm246_vm3, %v268_v55  ;;  %v237_v57 = vadd.f32 %v265_v50, %v229_v56 }
 0x2d2   :  { %v269_v58 = vpack.c.bf16 %v237_v57, %v237_v57 }
 0x2d4   :  { %248 = vst.msk [vmem:[%s405_s7 + $0x4] sm:$0xf] %vm246_vm3, %v269_v58 }

// kernel: _lambda_.12
= control target key start
LH: loop header
LB: loop body
LE: loop exit
PB: predicated region body
PF: predicated region fallthrough
CT: control target
= control target key end

     0   :  { %v209_v0 = vmov 0.0   ;;  %vm210_vm0 = vmmov 0   ;;  %vm51_vm1 = vcmask 261120   ;;  %vm167_vm2 = vcmask 257024   ;;  %s270_s1 = inlined_call_operand.vmem [shape: bf16[32,32], index: 1, kind: input, shape index: {}]   ;;  %s271_s0 = inlined_call_operand.vmem [shape: bf16[16,32], index: 0, kind: input, shape index: {}]   ;;  %s272_s2 = inlined_call_operand.vmem [shape: f32[1,32], index: 2, kind: input, shape index: {}]   ;;  %s273_s3 = inlined_call_operand.vmem [shape: f32[1,32], index: 3, kind: input, shape index: {}]   ;;  %s274_s4 = inlined_call_operand.vmem [shape: f32[1,32], index: 4, kind: input, shape index: {}]   ;;  %s275_s5 = inlined_call_operand.vmem [shape: bf16[16,32], index: 5, kind: output, shape index: {}]  }
   0x1   :  { %188 = vmatprep.subr.bf16.mxu0 %v209_v0  ;;  %v198_v1 = vld [vmem:[%s270_s1 + $0x8] sm:$0xff]   ;;  %192 = vmatprep.mubr.msk.bf16.mxu0 %vm210_vm0, %v209_v0  ;;  %v199_v2 = vld [vmem:[%s270_s1] sm:$0xff]  }
   0x2   :  { %189 = vmatpush3.bf16.msra.mxu0 %v198_v1  ;;  %v200_v3 = vld [vmem:[%s271_s0] sm:$0xff]  }
   0x3   :  { %190 = vmatprep.subr.bf16.mxu0 %v209_v0  ;;  %v174_v4 = vld [vmem:[%s272_s2] ss:$0 sm:$0xff] }
   0x4   :  { %v179_v30 = vld [vmem:[%s273_s3] ss:$0 sm:$0xff] }
   0x5   :  { %v180_v32 = vld [vmem:[%s274_s4] ss:$0 sm:$0xff] }
   0x6   :  { %191 = vmatpush3.bf16.msra.mxu0 %v199_v2 }
   0x9   :  { %193 = vmatmul.mubr.msk.bf16.vlgmr.msra.gmra.mxu0 %vm51_vm1, %v200_v3 }
  0xc9   :  { %v89_v5 = vpop.f32.mrf.mxu0 }
  0xca   :  { %v90_v6 = vadd.f32 %v174_v4, %v89_v5 }
  0xcb   :  { %v194_v7 = vpop.f32.mrf.mxu0 }
  0xcc   :  { %v98_v8 = vsel %vm51_vm1, %v90_v6, 0.0 }
  0xcd   :  { %99 = vadd.xlane.f32.xlu0 %v98_v8  ;;  %v92_v9 = vpop.f32.mrf.mxu0 }
  0xce   :  { %v93_v10 = vadd.f32 %v174_v4, %v92_v9 }
  0xcf   :  { %v195_v11 = vpop.f32.mrf.mxu0 }
  0xd0   :  { %v101_v12 = vsel %vm51_vm1, %v93_v10, 0.0 }
  0xd1   :  { %102 = vadd.xlane.f32.xlu0 %v101_v12 }
 0x156   :  { %v100_v13 = vpop.xlane.xlu0 %99 }
 0x157   :  { %v105_v14 = vmul.f32 0.03125, %v100_v13 }
 0x159   :  { %v107_v15 = vsub.f32 %v90_v6, %v105_v14 }
 0x15a   :  { %v103_v16 = vpop.xlane.xlu0 %102 }
 0x15b   :  { %v106_v17 = vmul.f32 0.03125, %v103_v16  ;;  %v109_v18 = vmul.f32 %v107_v15, %v107_v15 }
 0x15d   :  { %v108_v19 = vsub.f32 %v93_v10, %v106_v17  ;;  %v111_v20 = vsel %vm51_vm1, %v109_v18, 0.0 }
 0x15e   :  { %112 = vadd.xlane.f32.xlu1 %v111_v20 }
 0x15f   :  { %v110_v21 = vmul.f32 %v108_v19, %v108_v19 }
 0x161   :  { %v114_v22 = vsel %vm51_vm1, %v110_v21, 0.0 }
 0x162   :  { %115 = vadd.xlane.f32.xlu1 %v114_v22 }
 0x1e7   :  { %v113_v23 = vpop.xlane.xlu1 %112 }
 0x1e8   :  { %v117_v24 = vmul.f32 0.03125, %v113_v23 }
 0x1ea   :  { %v119_v25 = vadd.f32 1e-05, %v117_v24 }
 0x1eb   :  { %v116_v26 = vpop.xlane.xlu1 %115 }
 0x1ec   :  { %201 = vrsqrt.f32 %v119_v25  ;;  %v118_v27 = vmul.f32 0.03125, %v116_v26 }
 0x1ee   :  { %v120_v28 = vadd.f32 1e-05, %v118_v27 }
 0x1f0   :  { %203 = vrsqrt.f32 %v120_v28 }
 0x1f9   :  { %v202_v29 = vpop.eup %201 }
 0x1fa   :  { %v123_v31 = vmul.f32 %v202_v29, %v107_v15 }
 0x1fc   :  { %v131_v33 = vmul.f32 %v179_v30, %v123_v31 }
 0x1fd   :  { %v204_v34 = vpop.eup %203 }
 0x1fe   :  { %v139_v35 = vadd.f32 %v180_v32, %v131_v33  ;;  %v124_v36 = vmul.f32 %v204_v34, %v108_v19 }
 0x200   :  { %v143_v37 = vmul.f32 0.044715, %v139_v35  ;;  %v132_v38 = vmul.f32 %v179_v30, %v124_v36  ;;  %v141_v50 = vmul.f32 0.5, %v139_v35 }
 0x202   :  { %v145_v39 = vmul.f32 %v143_v37, %v139_v35  ;;  %v140_v40 = vadd.f32 %v180_v32, %v132_v38 }
 0x204   :  { %v147_v41 = vmul.f32 %v145_v39, %v139_v35  ;;  %v144_v42 = vmul.f32 0.044715, %v140_v40  ;;  %v142_v55 = vmul.f32 0.5, %v140_v40 }
 0x206   :  { %v149_v43 = vadd.f32 %v147_v41, %v139_v35  ;;  %v146_v44 = vmul.f32 %v144_v42, %v140_v40 }
 0x208   :  { %v151_v45 = vmul.f32 0.7978846, %v149_v43  ;;  %v148_v46 = vmul.f32 %v146_v44, %v140_v40 }
 0x20a   :  { %205 = vtanh.f32 %v151_v45  ;;  %v150_v47 = vadd.f32 %v148_v46, %v140_v40 }
 0x20c   :  { %v152_v48 = vmul.f32 0.7978846, %v150_v47 }
 0x20e   :  { %207 = vtanh.f32 %v152_v48 }
 0x217   :  { %v206_v49 = vpop.eup %205 }
 0x218   :  { %v155_v51 = vadd.f32 1.0, %v206_v49 }
 0x21a   :  { %v157_v52 = vmul.f32 %v155_v51, %v141_v50 }
 0x21b   :  { %v208_v53 = vpop.eup %207 }
 0x21c   :  { %v183_v54 = vpack.c.bf16 %v157_v52, %v157_v52  ;;  %v156_v56 = vadd.f32 1.0, %v208_v53 }
 0x21e   :  { %168 = vst.msk [vmem:[%s275_s5] sm:$0xf] %vm167_vm2, %v183_v54  ;;  %v158_v57 = vmul.f32 %v156_v56, %v142_v55 }
 0x220   :  { %v184_v58 = vpack.c.bf16 %v158_v57, %v158_v57 }
 0x222   :  { %169 = vst.msk [vmem:[%s275_s5 + $0x4] sm:$0xf] %vm167_vm2, %v184_v58 }

// kernel: _lambda_.10
= control target key start
LH: loop header
LB: loop body
LE: loop exit
PB: predicated region body
PF: predicated region fallthrough
CT: control target
= control target key end

     0   :  { %s1187_s24 = smov 0   ;;  %s1314_s0 = inlined_call_operand.vmem [shape: bf16[16,32], index: 0, kind: input, shape index: {}]   ;;  %s1315_s1 = inlined_call_operand.vmem [shape: bf16[32,96], index: 1, kind: input, shape index: {}]   ;;  %s1316_s2 = inlined_call_operand.vmem [shape: f32[1,96], index: 2, kind: input, shape index: {}]   ;;  %s1317_s3 = inlined_call_operand.vmem [shape: bf16[32,32], index: 3, kind: input, shape index: {}]   ;;  %s1318_s4 = inlined_call_operand.vmem [shape: f32[1,32], index: 4, kind: input, shape index: {}]   ;;  %s1319_s5 = inlined_call_operand.vmem [shape: f32[1,32], index: 5, kind: input, shape index: {}]   ;;  %s1320_s6 = inlined_call_operand.vmem [shape: f32[1,32], index: 6, kind: input, shape index: {}]   ;;  %s1321_s7 = inlined_call_operand.vmem [shape: bf16[16,32], index: 7, kind: output, shape index: {}]  }
   0x1 LB: > { %s964_s25 = sadd.s32 4294967295, %s1129_s24   ;;  %p968_p0 = scmp.ge.s32.totalorder %s1129_s24, 1  ;;  %s1129_s24 = sphi %s1187_s24, %s17_s24  }
   0x2   : > { %p236_p1 = scmp.lt.s32.totalorder %s1129_s24, 3 }
   0x4   : > { %p237_p2 = pnand %p968_p0, %p236_p1 }
   0x5   : > { %p266_p3 = scmp.lt.s32.totalorder (!%p237_p2), %s964_s25, 1  ;;  %s1133_s13 = smov (!%p237_p2), 120  }
   0x6   : > { %240 = sbr.rel (%p237_p2) target bundleno = 1736 (0x6c8), region = 48  ;;  %s1134_s14 = smov (!%p237_p2), 96  }
   0x7   : > { %s1135_s15 = smov (!%p237_p2), 80   ;;  %s1136_s16 = smov (!%p237_p2), 88  }
   0x8   : > { %s1137_s17 = smov (!%p237_p2), 72   ;;  %s1138_s18 = smov (!%p237_p2), 112  }
   0x9   : > { %s1139_s19 = smov (!%p237_p2), 104   ;;  %s1140_s20 = smov (!%p237_p2), 56  }
   0xa   : > { %s1141_s21 = smov (!%p237_p2), 64   ;;  %s1142_s22 = smov (!%p237_p2), 40  }
   0xb   : > { %v1101_v0 = vld [vmem:[%s1315_s1 + $0x8] sm:$0xff]   ;;  %v1131_v1 = vmov 0.0   ;;  %v1102_v2 = vld [vmem:[%s1315_s1] sm:$0xff]   ;;  %vm1132_vm0 = vmmov 0   ;;  %s1323_s25 = smov (!%p266_p3, %s964_s25), 1  ;;  %vm299_vm1 = vcmask 261120  }
   0xc   : > { %1013 = vmatprep.subr.bf16.mxu0 %v1131_v1  ;;  %1021 = vmatprep.subr.bf16.mxu1 %v1131_v1  ;;  %s969_s30 = sshll.u32 %s1323_s25, 2  ;;  %v971_v4 = vld [vmem:[%s1316_s2] ss:$0 sm:$0xff]  ;;  %vm347_vm2 = vcmask 64512   ;;  %s1143_s23 = smov 48   ;;  %vm412_vm3 = vcmask 1043456  }
   0xd   : > { %1014 = vmatpush3.bf16.msra.mxu0 %v1101_v0  ;;  %1017 = vmatprep.mubr.msk.bf16.mxu0 %vm1132_vm0, %v1131_v1  ;;  %s269_s10 = scalar_lea.vmem %s1314_s0, %s969_s30  ;;  %s1144_s26 = smov 8   ;;  %vm572_vm4 = vcmask 130112   ;;  %vm689_vm5 = vcmask 195712   ;;  %vm806_vm6 = vcmask 261312   ;;  %vm909_vm7 = vcmask 257024  }
   0xe   : > { %1015 = vmatprep.subr.bf16.mxu0 %v1131_v1  ;;  %1023 = vmatprep.mubr.msk.bf16.mxu1 %vm1132_vm0, %v1131_v1  ;;  %v1217_v3 = vld [vmem:[%s269_s10] sm:$0xf]  ;;  %s1145_s9 = smov 16   ;;  %s1146_s10 = smov 24  }
  0x11   : > { %1016 = vmatpush3.bf16.msra.mxu0 %v1102_v2 }
  0x12   : > { %1027 = vmatprep.subr.bf16.mxu0 %v1131_v1 }
  0x14   : > { %1018 = vmatmul.mubr.msk.bf16.vlgmr.msra.gmra.mxu0 %vm299_vm1, %v1217_v3 }
  0x15   : > { %1029 = vmatprep.mubr.msk.bf16.mxu0 %vm1132_vm0, %v1131_v1 }
  0xd4   : > { %v337_v5 = vpop.f32.mrf.mxu0 }
  0xd5   : > { %v338_v6 = vadd.f32 %v971_v4, %v337_v5 }
  0xd6   : > { %v1019_v7 = vpop.f32.mrf.mxu0 }
  0xd7   : > { %v1226_v8 = vpack.c.bf16 %v338_v6, %v338_v6 }
  0xd8   : > { %v340_v9 = vpop.f32.mrf.mxu0 }
  0xd9   : > { %457 = vrot.lane.b32.xlu1 %v1226_v8, %s1133_s13  ;;  %345 = vrot.lane.b32.xlu0 %v1226_v8, %s1134_s14 }
  0xda   : > { %v1020_v10 = vpop.f32.mrf.mxu0 }
  0xdd   : > { %576 = vrot.lane.b32.xlu1 %v1226_v8, %s1135_s15  ;;  %459 = vrot.lane.b32.xlu0 %v1226_v8, %s1136_s16 }
  0xe1   : > { %693 = vrot.lane.b32.xlu1 %v1226_v8, %s1137_s17  ;;  %574 = vrot.lane.b32.xlu0 %v1226_v8, %s1138_s18 }
  0xe5   : > { %691 = vrot.lane.b32.xlu0 %v1226_v8, %s1139_s19  ;;  %s273_s19 = scalar_lea.vmem %s1321_s7, %s969_s30 }
 0x14b   : > { %v346_v11 = vpop.permute.xlu0 %345  ;;  %v458_v14 = vpop.permute.xlu1 %457 }
 0x14c   : > { %v352_v12 = vsel %vm347_vm2, %v346_v11, 0 }
 0x14d   : > { %1022 = vmatpush3.bf16.xpose.msra.mxu1 %v352_v12 }
 0x14e   : > { %1033 = vmatprep.subr.bf16.mxu1 %v1131_v1 }
 0x14f   : > { %v460_v13 = vpop.permute.xlu0 %459  ;;  %v577_v16 = vpop.permute.xlu1 %576 }
 0x150   : > { %v465_v15 = vsel %vm347_vm2, %v460_v13, 0  ;;  %v582_v17 = vsel %vm347_vm2, %v577_v16, 0 }
 0x153   : > { %v694_v18 = vpop.permute.xlu1 %693  ;;  %v575_v19 = vpop.permute.xlu0 %574 }
 0x154   : > { %1024 = vmatmul.mubr.msk.bf16.vlgmr.msra.gmra.mxu1 %vm347_vm2, %v1226_v8  ;;  %v699_v20 = vsel %vm347_vm2, %v694_v18, 0 }
 0x155   : > { %1034 = vmatpush3.bf16.xpose.msra.mxu1 %v465_v15  ;;  %1035 = vmatprep.mubr.msk.bf16.mxu1 %vm1132_vm0, %v1131_v1 }
 0x156   : > { %1045 = vmatprep.subr.bf16.mxu1 %v1131_v1 }
 0x157   : > { %v692_v21 = vpop.permute.xlu0 %691 }
 0x15c   : > { %1036 = vmatmul.mubr.msk.bf16.vlgmr.msra.gmra.mxu1 %vm347_vm2, %v458_v14 }
 0x15d   : > { %1046 = vmatpush3.bf16.xpose.msra.mxu1 %v582_v17  ;;  %1047 = vmatprep.mubr.msk.bf16.mxu1 %vm1132_vm0, %v1131_v1 }
 0x15e   : > { %1057 = vmatprep.subr.bf16.mxu1 %v1131_v1 }
 0x164   : > { %1048 = vmatmul.mubr.msk.bf16.vlgmr.msra.gmra.mxu1 %vm347_vm2, %v575_v19 }
 0x165   : > { %1058 = vmatpush3.bf16.xpose.msra.mxu1 %v699_v20  ;;  %1059 = vmatprep.mubr.msk.bf16.mxu1 %vm1132_vm0, %v1131_v1 }
 0x166   : > { %1069 = vmatprep.subr.bf16.mxu1 %v1131_v1 }
 0x16c   : > { %1060 = vmatmul.mubr.msk.bf16.vlgmr.msra.gmra.mxu1 %vm347_vm2, %v692_v21 }
 0x16d   : > { %1073 = vmatprep.mubr.msk.bf16.mxu1 %vm1132_vm0, %v1131_v1 }
 0x214   : > { %v388_v22 = vpop.f32.mrf.mxu1 }
 0x215   : > { %v394_v23 = vmul.f32 0.35355338, %v388_v22 }
 0x216   : > { %v1025_v24 = vpop.f32.mrf.mxu1 }
 0x217   : > { %v395_v25 = vsel %vm347_vm2, %v394_v23, -inf }
 0x218   : > { %396 = vmax.xlane.f32.xlu1 %v395_v25  ;;  %v391_v26 = vpop.f32.mrf.mxu1 }
 0x21a   : > { %v1026_v27 = vpop.f32.mrf.mxu1 }
 0x21c   : > { %v501_v28 = vpop.f32.mrf.mxu1 }
 0x21d   : > { %v507_v29 = vmul.f32 0.35355338, %v501_v28 }
 0x21e   : > { %v1037_v30 = vpop.f32.mrf.mxu1 }
 0x21f   : > { %v508_v31 = vsel %vm347_vm2, %v507_v29, -inf }
 0x220   : > { %509 = vmax.xlane.f32.xlu0 %v508_v31  ;;  %v504_v32 = vpop.f32.mrf.mxu1 }
 0x222   : > { %v1038_v33 = vpop.f32.mrf.mxu1 }
 0x224   : > { %v618_v34 = vpop.f32.mrf.mxu1 }
 0x225   : > { %v624_v35 = vmul.f32 0.35355338, %v618_v34 }
 0x226   : > { %v1049_v36 = vpop.f32.mrf.mxu1 }
 0x227   : > { %v625_v37 = vsel %vm347_vm2, %v624_v35, -inf  ;;  %v1103_v36 = vld [vmem:[%s1317_s3 + $0x8] sm:$0xff]  }
 0x228   : > { %626 = vmax.xlane.f32.xlu0 %v625_v37  ;;  %v621_v38 = vpop.f32.mrf.mxu1  ;;  %1070 = vmatpush3.bf16.msra.mxu1 %v1103_v36 }
 0x229   : > { %v1104_v38 = vld [vmem:[%s1317_s3] sm:$0xff]   ;;  %1071 = vmatprep.subr.bf16.mxu1 %v1131_v1 }
 0x22a   : > { %v1050_v39 = vpop.f32.mrf.mxu1 }
 0x22c   : > { %v735_v40 = vpop.f32.mrf.mxu1  ;;  %1072 = vmatpush3.bf16.msra.mxu1 %v1104_v38 }
 0x22d   : > { %v741_v41 = vmul.f32 0.35355338, %v735_v40 }
 0x22e   : > { %v1061_v42 = vpop.f32.mrf.mxu1 }
 0x22f   : > { %v742_v43 = vsel %vm347_vm2, %v741_v41, -inf }
 0x230   : > { %743 = vmax.xlane.f32.xlu1 %v742_v43  ;;  %v738_v44 = vpop.f32.mrf.mxu1 }
 0x232   : > { %v1062_v45 = vpop.f32.mrf.mxu1 }
 0x2a1   : > { %v397_v46 = vpop.xlane.xlu1 %396 }
 0x2a2   : > { %v398_v47 = vsub.f32 %v394_v23, %v397_v46 }
 0x2a4   : > { %v399_v48 = vmul.f32 1.442695, %v398_v47 }
 0x2a6   : > { %1105 = vpow2.f32 %v399_v48 }
 0x2a9   : > { %v510_v49 = vpop.xlane.xlu0 %509 }
 0x2aa   : > { %v511_v50 = vsub.f32 %v507_v29, %v510_v49 }
 0x2ac   : > { %v512_v51 = vmul.f32 1.442695, %v511_v50  ;;  %v983_v50 = vld [vmem:[%s1318_s4] ss:$0 sm:$0xff] }
 0x2ae   : > { %1107 = vpow2.f32 %v512_v51  ;;  %v876_v51 = vunpack.c.l.bf16 %v1217_v3 }
 0x2b1   : > { %v627_v52 = vpop.xlane.xlu0 %626 }
 0x2b2   : > { %v628_v53 = vsub.f32 %v624_v35, %v627_v52 }
 0x2b3   : > { %v1106_v54 = vpop.eup %1105 }
 0x2b4   : > { %v629_v55 = vmul.f32 1.442695, %v628_v53  ;;  %v401_v56 = vsel %vm347_vm2, %v1106_v54, 0.0 }
 0x2b5   : > { %402 = vadd.xlane.f32.xlu0 %v401_v56 }
 0x2b6   : > { %1109 = vpow2.f32 %v629_v55 }
 0x2b9   : > { %v744_v61 = vpop.xlane.xlu1 %743 }
 0x2ba   : > { %v745_v62 = vsub.f32 %v741_v41, %v744_v61 }
 0x2bb   : > { %v1108_v57 = vpop.eup %1107 }
 0x2bc   : > { %v514_v58 = vsel %vm347_vm2, %v1108_v57, 0.0  ;;  %v746_v63 = vmul.f32 1.442695, %v745_v62 }
 0x2bd   : > { %515 = vadd.xlane.f32.xlu1 %v514_v58 }
 0x2be   : > { %1111 = vpow2.f32 %v746_v63 }
 0x2c3   : > { %v1110_v59 = vpop.eup %1109 }
 0x2c4   : > { %v631_v60 = vsel %vm347_vm2, %v1110_v59, 0.0 }
 0x2c5   : > { %632 = vadd.xlane.f32.xlu0 %v631_v60 }
 0x2cb   : > { %v1112_v0 = vpop.eup %1111 }
 0x2cc   : > { %v748_v2 = vsel %vm347_vm2, %v1112_v0, 0.0 }
 0x2ce   : > { %520 = vrot.lane.b32.xlu1 %v1226_v8, %s1140_s20 }
 0x2db   : > { %407 = vrot.lane.b32.xlu0 %v1226_v8, %s1141_s21 }
 0x2df   : > { %754 = vrot.lane.b32.xlu0 %v1226_v8, %s1142_s22 }
 0x2f2   : > { %749 = vadd.xlane.f32.xlu1 %v748_v2 }
 0x303   : > { %637 = vrot.lane.b32.xlu1 %v1226_v8, %s1143_s23 }
 0x33e   : > { %v403_v4 = vpop.xlane.xlu0 %402 }
 0x33f   : > { %1113 = vrcp.f32 %v403_v4 }
 0x346   : > { %v516_v5 = vpop.xlane.xlu1 %515 }
 0x347   : > { %1115 = vrcp.f32 %v516_v5  ;;  %v987_v5 = vld [vmem:[%s1319_s5] ss:$0 sm:$0xff] }
 0x34a   : > { %v521_v12 = vpop.permute.xlu1 %520 }
 0x34b   : > { %v526_v15 = vsel %vm412_vm3, %v521_v12, 0 }
 0x34c   : > { %v1114_v6 = vpop.eup %1113 }
 0x34d   : > { %v405_v9 = vmul.f32 %v1114_v6, %v1106_v54 }
 0x34e   : > { %v633_v7 = vpop.xlane.xlu0 %632 }
 0x34f   : > { %v406_v13 = vpack.c.bf16 %v405_v9, %v405_v9  ;;  %1117 = vrcp.f32 %v633_v7  ;;  %v988_v7 = vld [vmem:[%s1320_s6] ss:$0 sm:$0xff] }
 0x352   : > { %v408_v10 = vpop.permute.xlu0 %407 }
 0x353   : > { %v414_v11 = vsel %vm412_vm3, %v408_v10, 0 }
 0x354   : > { %1028 = vmatpush3.bf16.msra.mxu0 %v414_v11  ;;  %v1116_v14 = vpop.eup %1115 }
 0x355   : > { %1039 = vmatprep.subr.bf16.mxu0 %v1131_v1  ;;  %v518_v8 = vmul.f32 %v1116_v14, %v1108_v57 }
 0x356   : > { %v755_v22 = vpop.permute.xlu0 %754 }
 0x357   : > { %1030 = vmatmul.mubr.msk.bf16.vlgmr.msra.gmra.mxu0 %vm347_vm2, %v406_v13  ;;  %v519_v16 = vpack.c.bf16 %v518_v8, %v518_v8  ;;  %v760_v24 = vsel %vm412_vm3, %v755_v22, 0 }
 0x358   : > { %1040 = vmatpush3.bf16.msra.mxu0 %v526_v15  ;;  %1041 = vmatprep.mubr.msk.bf16.mxu0 %vm1132_vm0, %v1131_v1 }
 0x359   : > { %1051 = vmatprep.subr.bf16.mxu0 %v1131_v1 }
 0x35c   : > { %v1118_v17 = vpop.eup %1117 }
 0x35d   : > { %v635_v19 = vmul.f32 %v1118_v17, %v1110_v59 }
 0x35f   : > { %1042 = vmatmul.mubr.msk.bf16.vlgmr.msra.gmra.mxu0 %vm347_vm2, %v519_v16  ;;  %v636_v23 = vpack.c.bf16 %v635_v19, %v635_v19 }
 0x360   : > { %1053 = vmatprep.mubr.msk.bf16.mxu0 %vm1132_vm0, %v1131_v1 }
 0x37b   : > { %v750_v18 = vpop.xlane.xlu1 %749 }
 0x37c   : > { %1119 = vrcp.f32 %v750_v18 }
 0x37f   : > { %v638_v20 = vpop.permute.xlu1 %637 }
 0x380   : > { %v643_v21 = vsel %vm412_vm3, %v638_v20, 0 }
 0x381   : > { %1052 = vmatpush3.bf16.msra.mxu0 %v643_v21 }
 0x382   : > { %1063 = vmatprep.subr.bf16.mxu0 %v1131_v1 }
 0x384   : > { %1054 = vmatmul.mubr.msk.bf16.vlgmr.msra.gmra.mxu0 %vm347_vm2, %v636_v23 }
 0x385   : > { %1064 = vmatpush3.bf16.msra.mxu0 %v760_v24  ;;  %1065 = vmatprep.mubr.msk.bf16.mxu0 %vm1132_vm0, %v1131_v1 }
 0x389   : > { %v1120_v25 = vpop.eup %1119 }
 0x38a   : > { %v752_v26 = vmul.f32 %v1120_v25, %v1112_v0 }
 0x38c   : > { %v753_v27 = vpack.c.bf16 %v752_v26, %v752_v26 }
 0x38e   : > { %1066 = vmatmul.mubr.msk.bf16.vlgmr.msra.gmra.mxu0 %vm347_vm2, %v753_v27 }
 0x417   : > { %v450_v28 = vpop.f32.mrf.mxu0 }
 0x418   : > { %456 = vst.msk [vmem:[#allocation2] sm:$0xff] %vm347_vm2, %v450_v28 }
 0x419   : > { %v1031_v29 = vpop.f32.mrf.mxu0 }
 0x41b   : > { %v453_v30 = vpop.f32.mrf.mxu0 }
 0x41d   : > { %v1032_v31 = vpop.f32.mrf.mxu0 }
 0x41f   : > { %v562_v32 = vpop.f32.mrf.mxu0 }
 0x420   : > { %569 = vrot.lane.b32.xlu1 %v562_v32, %s1144_s26 }
 0x421   : > { %v1043_v33 = vpop.f32.mrf.mxu0 }
 0x423   : > { %v565_v34 = vpop.f32.mrf.mxu0 }
 0x425   : > { %v1044_v35 = vpop.f32.mrf.mxu0 }
 0x444   : > { %v679_v37 = vpop.f32.mrf.mxu0 }
 0x445   : > { %686 = vrot.lane.b32.xlu0 %v679_v37, %s1145_s9 }
 0x446   : > { %v1055_v39 = vpop.f32.mrf.mxu0 }
 0x448   : > { %v682_v40 = vpop.f32.mrf.mxu0 }
 0x44a   : > { %v1056_v41 = vpop.f32.mrf.mxu0 }
 0x44e   : > { %v796_v42 = vpop.f32.mrf.mxu0 }
 0x44f   : > { %803 = vrot.lane.b32.xlu1 %v796_v42, %s1146_s10 }
 0x450   : > { %v1067_v43 = vpop.f32.mrf.mxu0 }
 0x452   : > { %v799_v44 = vpop.f32.mrf.mxu0 }
 0x454   : > { %v1068_v45 = vpop.f32.mrf.mxu0 }
 0x492   : > { %v570_v46 = vpop.permute.xlu1 %569 }
 0x493   : > { %573 = vst.msk [vmem:[#allocation2] sm:$0xff] %vm572_vm4, %v570_v46 }
 0x4b7   : > { %v687_v47 = vpop.permute.xlu0 %686 }
 0x4b8   : > { %690 = vst.msk [vmem:[#allocation2] sm:$0xff] %vm689_vm5, %v687_v47 }
 0x4c1   : > { %v804_v48 = vpop.permute.xlu1 %803 }
 0x4c2   : > { %807 = vst.msk [vmem:[#allocation2] sm:$0xff] %vm806_vm6, %v804_v48 }
 0x4c9   : > { %v808_v1 = vld [vmem:[#allocation2] sm:$0xff] }
 0x4ca   : > { %v809_v49 = vpack.c.bf16 %v808_v1, %v808_v1 }
 0x4cc   : > { %1074 = vmatmul.mubr.msk.bf16.vlgmr.msra.gmra.mxu1 %vm299_vm1, %v809_v49 }
 0x58c   : > { %v870_v52 = vpop.f32.mrf.mxu1 }
 0x58d   : > { %v871_v53 = vadd.f32 %v983_v50, %v870_v52 }
 0x58e   : > { %v1075_v54 = vpop.f32.mrf.mxu1 }
 0x58f   : > { %v877_v55 = vadd.f32 %v876_v51, %v871_v53 }
 0x590   : > { %v873_v56 = vpop.f32.mrf.mxu1 }
 0x591   : > { %v880_v57 = vsel %vm299_vm1, %v877_v55, 0.0 }
 0x592   : > { %881 = vadd.xlane.f32.xlu0 %v880_v57  ;;  %v1076_v58 = vpop.f32.mrf.mxu1 }
 0x61b   : > { %v882_v59 = vpop.xlane.xlu0 %881 }
 0x61c   : > { %v884_v60 = vmul.f32 0.03125, %v882_v59 }
 0x61e   : > { %v885_v61 = vsub.f32 %v877_v55, %v884_v60 }
 0x620   : > { %v886_v62 = vmul.f32 %v885_v61, %v885_v61 }
 0x622   : > { %v887_v63 = vsel %vm299_vm1, %v886_v62, 0.0 }
 0x623   : > { %888 = vadd.xlane.f32.xlu1 %v887_v63 }
 0x6ac   : > { %v889_v0 = vpop.xlane.xlu1 %888 }
 0x6ad   : > { %v890_v2 = vmul.f32 0.03125, %v889_v0 }
 0x6af   : > { %v891_v3 = vadd.f32 1e-05, %v890_v2 }
 0x6b1   : > { %1121 = vrsqrt.f32 %v891_v3 }
 0x6be   : > { %v1122_v4 = vpop.eup %1121 }
 0x6bf   : > { %v893_v6 = vmul.f32 %v1122_v4, %v885_v61 }
 0x6c1   : > { %v900_v9 = vmul.f32 %v987_v5, %v893_v6 }
 0x6c3   : > { %v907_v10 = vadd.f32 %v988_v7, %v900_v9 }
 0x6c5   : > { %v908_v11 = vpack.c.bf16 %v907_v10, %v907_v10 }
 0x6c7   : > { %910 = vst.msk [vmem:[%s273_s19] sm:$0xf] %vm909_vm7, %v908_v11 }
 0x6c8 PF: > { %s17_s24 = sadd.s32 1, %s1129_s24  }
 0x6c9   : > { %p14_p4 = scmp.ge.s32.totalorder %s17_s24, 4  }
 0x6cb   :  { %16 = sbr.rel (!%p14_p4) target bundleno = 1 (0x1), region = 78 }

// kernel: _lambda_.13
= control target key start
LH: loop header
LB: loop body
LE: loop exit
PB: predicated region body
PF: predicated region fallthrough
CT: control target
= control target key end

     0   :  { %v278_v0 = vmov 0.0   ;;  %vm279_vm0 = vmmov 0   ;;  %vm60_vm1 = vcmask 261120   ;;  %vm226_vm2 = vcmask 257024   ;;  %s367_s1 = inlined_call_operand.vmem [shape: bf16[32,32], index: 1, kind: input, shape index: {}]   ;;  %s368_s0 = inlined_call_operand.vmem [shape: bf16[16,32], index: 0, kind: input, shape index: {}]   ;;  %s369_s2 = inlined_call_operand.vmem [shape: f32[1,32], index: 2, kind: input, shape index: {}]   ;;  %s370_s3 = inlined_call_operand.vmem [shape: bf16[16,32], index: 3, kind: input, shape index: {}]   ;;  %s371_s4 = inlined_call_operand.vmem [shape: f32[1,32], index: 4, kind: input, shape index: {}]   ;;  %s372_s5 = inlined_call_operand.vmem [shape: f32[1,32], index: 5, kind: input, shape index: {}]   ;;  %s373_s6 = inlined_call_operand.vmem [shape: f32[1,32], index: 6, kind: input, shape index: {}]   ;;  %s374_s7 = inlined_call_operand.vmem [shape: f32[1,32], index: 7, kind: input, shape index: {}]   ;;  %s375_s8 = inlined_call_operand.vmem [shape: bf16[16,32], index: 8, kind: output, shape index: {}]  }
   0x1   :  { %253 = vmatprep.subr.bf16.mxu0 %v278_v0  ;;  %v263_v1 = vld [vmem:[%s367_s1 + $0x8] sm:$0xff]   ;;  %257 = vmatprep.mubr.msk.bf16.mxu0 %vm279_vm0, %v278_v0  ;;  %v264_v2 = vld [vmem:[%s367_s1] sm:$0xff]  }
   0x2   :  { %254 = vmatpush3.bf16.msra.mxu0 %v263_v1  ;;  %v265_v3 = vld [vmem:[%s368_s0] sm:$0xff]  }
   0x3   :  { %255 = vmatprep.subr.bf16.mxu0 %v278_v0  ;;  %v233_v4 = vld [vmem:[%s369_s2] ss:$0 sm:$0xff] }
   0x4   :  { %v238_v30 = vld [vmem:[%s371_s4] ss:$0 sm:$0xff] }
   0x5   :  { %v247_v31 = vld [vmem:[%s370_s3] sm:$0xff]  }
   0x6   :  { %256 = vmatpush3.bf16.msra.mxu0 %v264_v2  ;;  %v239_v33 = vld [vmem:[%s372_s5] ss:$0 sm:$0xff]  ;;  %v248_v35 = vunpack.c.l.bf16 %v247_v31  ;;  %v249_v41 = vunpack.c.h.bf16 %v247_v31 }
   0x7   :  { %v240_v63 = vld [vmem:[%s373_s6] ss:$0 sm:$0xff] }
   0x8   :  { %v241_v1 = vld [vmem:[%s374_s7] ss:$0 sm:$0xff] }
   0x9   :  { %258 = vmatmul.mubr.msk.bf16.vlgmr.msra.gmra.mxu0 %vm60_vm1, %v265_v3 }
  0xc9   :  { %v98_v5 = vpop.f32.mrf.mxu0 }
  0xca   :  { %v99_v6 = vadd.f32 %v233_v4, %v98_v5 }
  0xcb   :  { %v259_v7 = vpop.f32.mrf.mxu0 }
  0xcc   :  { %v107_v8 = vsel %vm60_vm1, %v99_v6, 0.0 }
  0xcd   :  { %108 = vadd.xlane.f32.xlu0 %v107_v8  ;;  %v101_v9 = vpop.f32.mrf.mxu0 }
  0xce   :  { %v102_v10 = vadd.f32 %v233_v4, %v101_v9 }
  0xcf   :  { %v260_v11 = vpop.f32.mrf.mxu0 }
  0xd0   :  { %v110_v12 = vsel %vm60_vm1, %v102_v10, 0.0 }
  0xd1   :  { %111 = vadd.xlane.f32.xlu0 %v110_v12 }
 0x156   :  { %v109_v13 = vpop.xlane.xlu0 %108 }
 0x157   :  { %v114_v14 = vmul.f32 0.03125, %v109_v13 }
 0x159   :  { %v116_v15 = vsub.f32 %v99_v6, %v114_v14 }
 0x15a   :  { %v112_v16 = vpop.xlane.xlu0 %111 }
 0x15b   :  { %v115_v17 = vmul.f32 0.03125, %v112_v16  ;;  %v118_v18 = vmul.f32 %v116_v15, %v116_v15 }
 0x15d   :  { %v117_v19 = vsub.f32 %v102_v10, %v115_v17  ;;  %v120_v20 = vsel %vm60_vm1, %v118_v18, 0.0 }
 0x15e   :  { %121 = vadd.xlane.f32.xlu1 %v120_v20 }
 0x15f   :  { %v119_v21 = vmul.f32 %v117_v19, %v117_v19 }
 0x161   :  { %v123_v22 = vsel %vm60_vm1, %v119_v21, 0.0 }
 0x162   :  { %124 = vadd.xlane.f32.xlu1 %v123_v22 }
 0x1e7   :  { %v122_v23 = vpop.xlane.xlu1 %121 }
 0x1e8   :  { %v126_v24 = vmul.f32 0.03125, %v122_v23 }
 0x1ea   :  { %v128_v25 = vadd.f32 1e-05, %v126_v24 }
 0x1eb   :  { %v125_v26 = vpop.xlane.xlu1 %124 }
 0x1ec   :  { %266 = vrsqrt.f32 %v128_v25  ;;  %v127_v27 = vmul.f32 0.03125, %v125_v26 }
 0x1ee   :  { %v129_v28 = vadd.f32 1e-05, %v127_v27 }
 0x1f0   :  { %268 = vrsqrt.f32 %v129_v28 }
 0x1f9   :  { %v267_v29 = vpop.eup %266 }
 0x1fa   :  { %v132_v32 = vmul.f32 %v267_v29, %v116_v15 }
 0x1fc   :  { %v140_v34 = vmul.f32 %v238_v30, %v132_v32 }
 0x1fd   :  { %v269_v36 = vpop.eup %268 }
 0x1fe   :  { %v148_v37 = vadd.f32 %v239_v33, %v140_v34  ;;  %v133_v38 = vmul.f32 %v269_v36, %v117_v19 }
 0x200   :  { %v154_v39 = vadd.f32 %v248_v35, %v148_v37  ;;  %v141_v40 = vmul.f32 %v238_v30, %v133_v38 }
 0x202   :  { %v158_v42 = vsel %vm60_vm1, %v154_v39, 0.0  ;;  %v149_v43 = vadd.f32 %v239_v33, %v141_v40 }
 0x203   :  { %159 = vadd.xlane.f32.xlu0 %v158_v42 }
 0x204   :  { %v155_v44 = vadd.f32 %v249_v41, %v149_v43 }
 0x206   :  { %v161_v45 = vsel %vm60_vm1, %v155_v44, 0.0 }
 0x207   :  { %162 = vadd.xlane.f32.xlu1 %v161_v45 }
 0x28c   :  { %v160_v46 = vpop.xlane.xlu0 %159 }
 0x28d   :  { %v164_v47 = vmul.f32 0.03125, %v160_v46 }
 0x28f   :  { %v166_v48 = vsub.f32 %v154_v39, %v164_v47 }
 0x290   :  { %v163_v49 = vpop.xlane.xlu1 %162 }
 0x291   :  { %v165_v50 = vmul.f32 0.03125, %v163_v49  ;;  %v168_v51 = vmul.f32 %v166_v48, %v166_v48 }
 0x293   :  { %v167_v52 = vsub.f32 %v155_v44, %v165_v50  ;;  %v170_v53 = vsel %vm60_vm1, %v168_v51, 0.0 }
 0x294   :  { %171 = vadd.xlane.f32.xlu0 %v170_v53 }
 0x295   :  { %v169_v54 = vmul.f32 %v167_v52, %v167_v52 }
 0x297   :  { %v173_v55 = vsel %vm60_vm1, %v169_v54, 0.0 }
 0x298   :  { %174 = vadd.xlane.f32.xlu1 %v173_v55 }
 0x31d   :  { %v172_v56 = vpop.xlane.xlu0 %171 }
 0x31e   :  { %v176_v57 = vmul.f32 0.03125, %v172_v56 }
 0x320   :  { %v178_v58 = vadd.f32 1e-05, %v176_v57 }
 0x321   :  { %v175_v59 = vpop.xlane.xlu1 %174 }
 0x322   :  { %270 = vrsqrt.f32 %v178_v58  ;;  %v177_v60 = vmul.f32 0.03125, %v175_v59 }
 0x324   :  { %v179_v61 = vadd.f32 1e-05, %v177_v60 }
 0x326   :  { %272 = vrsqrt.f32 %v179_v61 }
 0x32f   :  { %v271_v62 = vpop.eup %270 }
 0x330   :  { %v182_v0 = vmul.f32 %v271_v62, %v166_v48 }
 0x332   :  { %v190_v2 = vmul.f32 %v240_v63, %v182_v0 }
 0x333   :  { %v273_v3 = vpop.eup %272 }
 0x334   :  { %v198_v4 = vadd.f32 %v241_v1, %v190_v2  ;;  %v183_v5 = vmul.f32 %v273_v3, %v167_v52 }
 0x336   :  { %v202_v6 = vmul.f32 0.044715, %v198_v4  ;;  %v191_v7 = vmul.f32 %v240_v63, %v183_v5  ;;  %v200_v19 = vmul.f32 0.5, %v198_v4 }
 0x338   :  { %v204_v8 = vmul.f32 %v202_v6, %v198_v4  ;;  %v199_v9 = vadd.f32 %v241_v1, %v191_v7 }
 0x33a   :  { %v206_v10 = vmul.f32 %v204_v8, %v198_v4  ;;  %v203_v11 = vmul.f32 0.044715, %v199_v9  ;;  %v201_v24 = vmul.f32 0.5, %v199_v9 }
 0x33c   :  { %v208_v12 = vadd.f32 %v206_v10, %v198_v4  ;;  %v205_v13 = vmul.f32 %v203_v11, %v199_v9 }
 0x33e   :  { %v210_v14 = vmul.f32 0.7978846, %v208_v12  ;;  %v207_v15 = vmul.f32 %v205_v13, %v199_v9 }
 0x340   :  { %274 = vtanh.f32 %v210_v14  ;;  %v209_v16 = vadd.f32 %v207_v15, %v199_v9 }
 0x342   :  { %v211_v17 = vmul.f32 0.7978846, %v209_v16 }
 0x344   :  { %276 = vtanh.f32 %v211_v17 }
 0x34d   :  { %v275_v18 = vpop.eup %274 }
 0x34e   :  { %v214_v20 = vadd.f32 1.0, %v275_v18 }
 0x350   :  { %v216_v21 = vmul.f32 %v214_v20, %v200_v19 }
 0x351   :  { %v277_v22 = vpop.eup %276 }
 0x352   :  { %v244_v23 = vpack.c.bf16 %v216_v21, %v216_v21  ;;  %v215_v25 = vadd.f32 1.0, %v277_v22 }
 0x354   :  { %227 = vst.msk [vmem:[%s375_s8] sm:$0xf] %vm226_vm2, %v244_v23  ;;  %v217_v26 = vmul.f32 %v215_v25, %v201_v24 }
 0x356   :  { %v245_v27 = vpack.c.bf16 %v217_v26, %v217_v26 }
 0x358   :  { %228 = vst.msk [vmem:[%s375_s8 + $0x4] sm:$0xf] %vm226_vm2, %v245_v27 }

</bundles_post_ra>
